<compile_context>
chip_gen: v5e
topology: v5e:2x2
jax: 0.10.0
libtpu: 0.0.40
codegen_flags: <defaults>
</compile_context>

<pallas_src>
import math

import jax
import jax.numpy as jnp
from jax import lax
from jax.experimental import pallas as pl
from jax.experimental.pallas import tpu as pltpu

LN_EPS = 1e-5
KSIZE = 3  # kernel_size=3, stride=1, padding=1 (defaults of MyBlock)


def _gelu(x):
    # exact (erf-based) GELU, matching torch.nn.GELU() default
    return 0.5 * x * (1.0 + lax.erf(x / jnp.sqrt(2.0).astype(x.dtype)))


def _make_myblock_kernel(H, W, Cin, Cout):
    """Builds the fused kernel for fixed spatial/channel sizes."""
    HW = H * W
    PAD = W + 1            # flat zero-pad on each side of the H*W axis
    PADW = HW + 2 * PAD    # padded flat width
    Cmax = max(Cin, Cout)  # single shared pad / im2col scratch serves both convs
    KK = KSIZE * KSIZE

    def kernel(x_ref, gamma_ref, beta_ref, w1_ref, b1_ref, w2_ref, b2_ref,
               o_ref, pad_ref, col_ref):
        # x_ref:      (1, Cin, HW)        one batch element, channels-major flat
        # gamma/beta: (Cin, HW)           LayerNorm affine
        # w1_ref:     (Cout, KK*Cin)      conv1 weights, rows = taps x in-chan
        # b1_ref:     (Cout, 1)
        # w2_ref:     (Cout, KK*Cout)
        # b2_ref:     (Cout, 1)
        # o_ref:      (1, Cout, HW)
        # pad_ref:    (Cmax, PADW)        shared flat-padded VMEM scratch
        # col_ref:    (KK*Cmax, HW)       shared im2col VMEM scratch
        x = x_ref[0]  # (Cin, HW), f32

        # ---- LayerNorm over the whole sample (== nn.LayerNorm((C,H,W))) ----
        mean = jnp.mean(x)
        var = jnp.mean((x - mean) ** 2)          # biased variance, like PyTorch
        xn = (x - mean) * lax.rsqrt(var + LN_EPS)
        xn = xn * gamma_ref[...] + beta_ref[...]

        # Horizontal-wrap masks (dw = -1 / +1). Vertical out-of-range taps land
        # in the zeroed flat-pad border, so only the W-wrap needs masking.
        col = lax.broadcasted_iota(jnp.int32, (1, HW), 1) % W
        mask_l = (col != 0).astype(jnp.float32)        # tap dw == -1
        mask_r = (col != (W - 1)).astype(jnp.float32)  # tap dw == +1

        # Zero only the pad border; interiors are overwritten below. Done every
        # grid step (scratch is per-core, no reliance on step 0 running here).
        pad_ref[:, 0:PAD] = jnp.zeros((Cmax, PAD), jnp.float32)
        pad_ref[:, PAD + HW:PADW] = jnp.zeros((Cmax, PAD), jnp.float32)

        def conv3x3(cin, w_ref, b_ref):
            # Build im2col rows (tap-major, channel-minor) from 9 static lane
            # shifts of the padded buffer, then ONE MXU matmul:
            #   (Cout, KK*cin) @ (KK*cin, HW), f32 accumulation.
            for kh in range(KSIZE):
                for kw in range(KSIZE):
                    off = kh * W + kw                       # static lane offset
                    patch = pad_ref[0:cin, off:off + HW]    # (cin, HW)
                    if kw == 0:
                        patch = patch * mask_l
                    elif kw == 2:
                        patch = patch * mask_r
                    t = kh * KSIZE + kw
                    col_ref[t * cin:(t + 1) * cin, :] = patch
            acc = jnp.dot(w_ref[...], col_ref[0:KK * cin, :],
                          preferred_element_type=jnp.float32)  # (Cout, HW)
            return _gelu(acc + b_ref[...])                     # bias added once

        # ---- conv1 (3x3, stride 1, pad 1) + GELU ----
        pad_ref[0:Cin, PAD:PAD + HW] = xn
        h1 = conv3x3(Cin, w1_ref, b1_ref)                   # (Cout, HW)

        # ---- conv2 (3x3, stride 1, pad 1) + GELU ----
        pad_ref[0:Cout, PAD:PAD + HW] = h1
        o_ref[0] = conv3x3(Cout, w2_ref, b2_ref).astype(o_ref.dtype)

    return kernel, Cmax, PADW, KK


def myblock_forward(x_nchw, gamma_chw, beta_chw, w1_oihw, b1, w2_oihw, b2):
    """Runs MyBlock.forward. Inputs use PyTorch layouts (NCHW / CHW / OIHW)."""
    N, Cin, H, W = x_nchw.shape
    Cout = w1_oihw.shape[0]
    HW = H * W

    kernel, Cmax, PADW, KK = _make_myblock_kernel(H, W, Cin, Cout)

    # glue: reshapes only for activations (no transposes); weights -> im2col
    # matrix with columns ordered (kh, kw, cin) to match the kernel's scratch.
    x = x_nchw.reshape(N, Cin, HW)
    gamma = gamma_chw.reshape(Cin, HW)
    beta = beta_chw.reshape(Cin, HW)
    # OIHW -> (O, K, K, I) -> (O, K*K*I)
    w1 = jnp.transpose(w1_oihw, (0, 2, 3, 1)).reshape(Cout, KK * Cin)
    w2 = jnp.transpose(w2_oihw, (0, 2, 3, 1)).reshape(Cout, KK * Cout)
    b1r = b1.reshape(Cout, 1)
    b2r = b2.reshape(Cout, 1)

    out_flat = pl.pallas_call(
        kernel,
        out_shape=jax.ShapeDtypeStruct((N, Cout, HW), x.dtype),
        grid_spec=pltpu.PrefetchScalarGridSpec(
            num_scalar_prefetch=0,
            grid=(N,),
            in_specs=[
                pl.BlockSpec((1, Cin, HW), lambda b: (b, 0, 0)),
                pl.BlockSpec((Cin, HW), lambda b: (0, 0)),
                pl.BlockSpec((Cin, HW), lambda b: (0, 0)),
                pl.BlockSpec((Cout, KK * Cin), lambda b: (0, 0)),
                pl.BlockSpec((Cout, 1), lambda b: (0, 0)),
                pl.BlockSpec((Cout, KK * Cout), lambda b: (0, 0)),
                pl.BlockSpec((Cout, 1), lambda b: (0, 0)),
            ],
            out_specs=pl.BlockSpec((1, Cout, HW), lambda b: (b, 0, 0)),
            scratch_shapes=[
                pltpu.VMEM((Cmax, PADW), jnp.float32),      # flat-padded input
                pltpu.VMEM((KK * Cmax, HW), jnp.float32),   # im2col buffer
            ],
        ),
        compiler_params=pltpu.CompilerParams(
            dimension_semantics=("parallel",)),  # v7x: shard batch across TCs
    )(x, gamma, beta, w1, b1r, w2, b2r)

    return out_flat.reshape(N, Cout, H, W)  # back to NCHW (pure reshape)


def myblock_reference(x, gamma, beta, w1, b1, w2, b2):
    """Pure-JAX reference (NCHW), mirrors the PyTorch module exactly."""
    mean = x.mean(axis=(1, 2, 3), keepdims=True)
    var = ((x - mean) ** 2).mean(axis=(1, 2, 3), keepdims=True)
    out = (x - mean) / jnp.sqrt(var + LN_EPS) * gamma[None] + beta[None]

    def conv(y, w, b):
        y = lax.conv_general_dilated(
            y, w, window_strides=(1, 1), padding=((1, 1), (1, 1)),
            dimension_numbers=("NCHW", "OIHW", "NCHW"))
        return y + b[None, :, None, None]

    out = _gelu(conv(out, w1, b1))
    out = _gelu(conv(out, w2, b2))
    return out


if __name__ == "__main__":
    # small shapes: batch=2, in_c=4, out_c=8, spatial 16x16
    N, Cin, Cout, H, W = 2, 4, 8, 16, 16

    key = jax.random.PRNGKey(0)
    k_x, k_w1, k_b1, k_w2, k_b2 = jax.random.split(key, 5)

    x = jax.random.normal(k_x, (N, Cin, H, W), dtype=jnp.float32)

    # LayerNorm((Cin, H, W)) params -- PyTorch default init (ones / zeros)
    gamma = jnp.ones((Cin, H, W), dtype=jnp.float32)
    beta = jnp.zeros((Cin, H, W), dtype=jnp.float32)

    # Conv2d params, deterministic uniform init (fan-in bound, like PyTorch)
    bound1 = 1.0 / math.sqrt(Cin * KSIZE * KSIZE)
    w1 = jax.random.uniform(k_w1, (Cout, Cin, KSIZE, KSIZE),
                            minval=-bound1, maxval=bound1, dtype=jnp.float32)
    b1 = jax.random.uniform(k_b1, (Cout,), minval=-bound1, maxval=bound1,
                            dtype=jnp.float32)
    bound2 = 1.0 / math.sqrt(Cout * KSIZE * KSIZE)
    w2 = jax.random.uniform(k_w2, (Cout, Cout, KSIZE, KSIZE),
                            minval=-bound2, maxval=bound2, dtype=jnp.float32)
    b2 = jax.random.uniform(k_b2, (Cout,), minval=-bound2, maxval=bound2,
                            dtype=jnp.float32)

    out = myblock_forward(x, gamma, beta, w1, b1, w2, b2)
    out = jax.block_until_ready(out)
    assert out.shape == (N, Cout, H, W), out.shape

    ref = jax.block_until_ready(myblock_reference(x, gamma, beta, w1, b1, w2, b2))
    assert jnp.allclose(out, ref, atol=1e-4, rtol=1e-4), \
        float(jnp.max(jnp.abs(out - ref)))

    print("KERNEL_OK")
</pallas_src>

<mosaic_0001>
module attributes {stable_mosaic.version = 11 : i64} {
  func.func @kernel(%arg0: i32, %arg1: memref<1x4x256xf32, #tpu.memory_space<vmem>>, %arg2: memref<4x256xf32, #tpu.memory_space<vmem>>, %arg3: memref<4x256xf32, #tpu.memory_space<vmem>>, %arg4: memref<8x36xf32, #tpu.memory_space<vmem>>, %arg5: memref<8x1xf32, #tpu.memory_space<vmem>>, %arg6: memref<8x72xf32, #tpu.memory_space<vmem>>, %arg7: memref<8x1xf32, #tpu.memory_space<vmem>>, %arg8: memref<1x8x256xf32, #tpu.memory_space<vmem>>, %arg9: memref<8x290xf32, #tpu.memory_space<vmem>>, %arg10: memref<72x256xf32, #tpu.memory_space<vmem>>) attributes {dimension_semantics = [#tpu.dimension_semantics<parallel>], iteration_bounds = array<i64: 2>, scalar_prefetch = 0 : i64, scratch_operands = 2 : i64, tpu.core_type = #tpu.core_type<tc>, window_params = [{transform_indices = @transform_0, window_bounds = array<i64: 1, 4, 256>}, {pipeline_mode = #tpu.pipeline_mode<synchronous>, transform_indices = @transform_1, window_bounds = array<i64: 4, 256>}, {pipeline_mode = #tpu.pipeline_mode<synchronous>, transform_indices = @transform_2, window_bounds = array<i64: 4, 256>}, {pipeline_mode = #tpu.pipeline_mode<synchronous>, transform_indices = @transform_3, window_bounds = array<i64: 8, 36>}, {pipeline_mode = #tpu.pipeline_mode<synchronous>, transform_indices = @transform_4, window_bounds = array<i64: 8, 1>}, {pipeline_mode = #tpu.pipeline_mode<synchronous>, transform_indices = @transform_5, window_bounds = array<i64: 8, 72>}, {pipeline_mode = #tpu.pipeline_mode<synchronous>, transform_indices = @transform_6, window_bounds = array<i64: 8, 1>}, {transform_indices = @transform_7, window_bounds = array<i64: 1, 8, 256>}]} {
    %c0 = arith.constant 0 : index
    %c0_0 = arith.constant 0 : index
    %c0_1 = arith.constant 0 : index
    %0 = vector.load %arg1[%c0, %c0_0, %c0_1] : memref<1x4x256xf32, #tpu.memory_space<vmem>>, vector<1x4x256xf32>
    %1 = vector.shape_cast %0 : vector<1x4x256xf32> to vector<4x256xf32>
    %2 = vector.shape_cast %1 : vector<4x256xf32> to vector<1x4x256xf32>
    %cst = arith.constant dense<0.000000e+00> : vector<1xf32>
    %3 = vector.multi_reduction <add>, %2, %cst [1, 2] : vector<1x4x256xf32> to vector<1xf32>
    %4 = vector.shape_cast %3 : vector<1xf32> to vector<1x1x1xf32>
    %5 = vector.extract %4[0, 0, 0] : f32 from vector<1x1x1xf32>
    %cst_2 = arith.constant 1.024000e+03 : f32
    %6 = arith.divf %5, %cst_2 : f32
    %7 = vector.broadcast %6 : f32 to vector<4x256xf32>
    %8 = arith.subf %1, %7 : vector<4x256xf32>
    %9 = arith.mulf %8, %8 : vector<4x256xf32>
    %10 = vector.shape_cast %9 : vector<4x256xf32> to vector<1x4x256xf32>
    %cst_3 = arith.constant dense<0.000000e+00> : vector<1xf32>
    %11 = vector.multi_reduction <add>, %10, %cst_3 [1, 2] : vector<1x4x256xf32> to vector<1xf32>
    %12 = vector.shape_cast %11 : vector<1xf32> to vector<1x1x1xf32>
    %13 = vector.extract %12[0, 0, 0] : f32 from vector<1x1x1xf32>
    %cst_4 = arith.constant 1.024000e+03 : f32
    %14 = arith.divf %13, %cst_4 : f32
    %15 = vector.broadcast %6 : f32 to vector<4x256xf32>
    %16 = arith.subf %1, %15 : vector<4x256xf32>
    %cst_5 = arith.constant 9.99999974E-6 : f32
    %17 = arith.addf %14, %cst_5 : f32
    %18 = math.rsqrt %17 : f32
    %19 = vector.broadcast %18 : f32 to vector<4x256xf32>
    %20 = arith.mulf %16, %19 : vector<4x256xf32>
    %c0_6 = arith.constant 0 : index
    %c0_7 = arith.constant 0 : index
    %21 = vector.load %arg2[%c0_6, %c0_7] : memref<4x256xf32, #tpu.memory_space<vmem>>, vector<4x256xf32>
    %22 = arith.mulf %20, %21 : vector<4x256xf32>
    %c0_8 = arith.constant 0 : index
    %c0_9 = arith.constant 0 : index
    %23 = vector.load %arg3[%c0_8, %c0_9] : memref<4x256xf32, #tpu.memory_space<vmem>>, vector<4x256xf32>
    %24 = arith.addf %22, %23 : vector<4x256xf32>
    %25 = tpu.iota {dimensions = array<i32: 1>} : vector<1x256xi32>
    %c16_i32 = arith.constant 16 : i32
    %c0_i32 = arith.constant 0 : i32
    %26 = arith.cmpi eq, %c16_i32, %c0_i32 : i32
    %c1_i32 = arith.constant 1 : i32
    %27 = arith.select %26, %c1_i32, %c16_i32 : i32
    %28 = vector.broadcast %27 : i32 to vector<1x256xi32>
    %29 = arith.remsi %25, %28 : vector<1x256xi32>
    %c0_i32_10 = arith.constant 0 : i32
    %30 = vector.broadcast %c0_i32_10 : i32 to vector<1x256xi32>
    %31 = arith.cmpi ne, %29, %30 : vector<1x256xi32>
    %c0_i32_11 = arith.constant 0 : i32
    %32 = vector.broadcast %c0_i32_11 : i32 to vector<1x256xi32>
    %33 = arith.cmpi slt, %29, %32 : vector<1x256xi32>
    %c0_i32_12 = arith.constant 0 : i32
    %34 = arith.cmpi slt, %27, %c0_i32_12 : i32
    %35 = vector.broadcast %34 : i1 to vector<1x256xi1>
    %36 = vector.broadcast %35 : vector<1x256xi1> to vector<1x256xi1>
    %37 = arith.xori %33, %36 : vector<1x256xi1>
    %38 = arith.andi %37, %31 : vector<1x256xi1>
    %39 = vector.broadcast %27 : i32 to vector<1x256xi32>
    %40 = arith.addi %29, %39 : vector<1x256xi32>
    %41 = arith.select %38, %40, %29 : vector<1x256xi1>, vector<1x256xi32>
    %c0_i32_13 = arith.constant 0 : i32
    %42 = vector.broadcast %c0_i32_13 : i32 to vector<1x256xi32>
    %43 = arith.cmpi ne, %41, %42 : vector<1x256xi32>
    %44 = arith.extui %43 : vector<1x256xi1> to vector<1x256xi32>
    %45 = arith.sitofp %44 : vector<1x256xi32> to vector<1x256xf32>
    %c15_i32 = arith.constant 15 : i32
    %46 = vector.broadcast %c15_i32 : i32 to vector<1x256xi32>
    %47 = arith.cmpi ne, %41, %46 : vector<1x256xi32>
    %48 = arith.extui %47 : vector<1x256xi1> to vector<1x256xi32>
    %49 = arith.sitofp %48 : vector<1x256xi32> to vector<1x256xf32>
    %cst_14 = arith.constant 0.000000e+00 : f32
    %50 = vector.broadcast %cst_14 : f32 to vector<8x17xf32>
    %c0_15 = arith.constant 0 : index
    %c0_16 = arith.constant 0 : index
    %51 = vector.load %arg9[%c0_15, %c0_16] : memref<8x290xf32, #tpu.memory_space<vmem>>, vector<8x17xf32>
    tpu.vector_store %arg9[%c0_15, %c0_16], %50 {strides = array<i32>} : memref<8x290xf32, #tpu.memory_space<vmem>>, vector<8x17xf32>,
    %cst_17 = arith.constant 0.000000e+00 : f32
    %52 = vector.broadcast %cst_17 : f32 to vector<8x17xf32>
    %c0_18 = arith.constant 0 : index
    %c273 = arith.constant 273 : index
    %53 = vector.load %arg9[%c0_18, %c273] : memref<8x290xf32, #tpu.memory_space<vmem>>, vector<8x17xf32>
    tpu.vector_store %arg9[%c0_18, %c273], %52 {strides = array<i32>} : memref<8x290xf32, #tpu.memory_space<vmem>>, vector<8x17xf32>,
    %c0_19 = arith.constant 0 : index
    %c17 = arith.constant 17 : index
    %54 = vector.load %arg9[%c0_19, %c17] : memref<8x290xf32, #tpu.memory_space<vmem>>, vector<4x256xf32>
    tpu.vector_store %arg9[%c0_19, %c17], %24 {strides = array<i32>} : memref<8x290xf32, #tpu.memory_space<vmem>>, vector<4x256xf32>,
    %c0_20 = arith.constant 0 : index
    %c0_21 = arith.constant 0 : index
    %55 = vector.load %arg9[%c0_20, %c0_21] : memref<8x290xf32, #tpu.memory_space<vmem>>, vector<4x256xf32>
    %56 = vector.broadcast %45 : vector<1x256xf32> to vector<4x256xf32>
    %57 = arith.mulf %55, %56 : vector<4x256xf32>
    %c0_22 = arith.constant 0 : index
    %c0_23 = arith.constant 0 : index
    %58 = vector.load %arg10[%c0_22, %c0_23] : memref<72x256xf32, #tpu.memory_space<vmem>>, vector<4x256xf32>
    tpu.vector_store %arg10[%c0_22, %c0_23], %57 {strides = array<i32>} : memref<72x256xf32, #tpu.memory_space<vmem>>, vector<4x256xf32>,
    %c0_24 = arith.constant 0 : index
    %c1 = arith.constant 1 : index
    %59 = vector.load %arg9[%c0_24, %c1] : memref<8x290xf32, #tpu.memory_space<vmem>>, vector<4x256xf32>
    %c4 = arith.constant 4 : index
    %c0_25 = arith.constant 0 : index
    %60 = vector.load %arg10[%c4, %c0_25] : memref<72x256xf32, #tpu.memory_space<vmem>>, vector<4x256xf32>
    tpu.vector_store %arg10[%c4, %c0_25], %59 {strides = array<i32>} : memref<72x256xf32, #tpu.memory_space<vmem>>, vector<4x256xf32>,
    %c0_26 = arith.constant 0 : index
    %c2 = arith.constant 2 : index
    %61 = vector.load %arg9[%c0_26, %c2] : memref<8x290xf32, #tpu.memory_space<vmem>>, vector<4x256xf32>
    %62 = vector.broadcast %49 : vector<1x256xf32> to vector<4x256xf32>
    %63 = arith.mulf %61, %62 : vector<4x256xf32>
    %c8 = arith.constant 8 : index
    %c0_27 = arith.constant 0 : index
    %64 = vector.load %arg10[%c8, %c0_27] : memref<72x256xf32, #tpu.memory_space<vmem>>, vector<4x256xf32>
    tpu.vector_store %arg10[%c8, %c0_27], %63 {strides = array<i32>} : memref<72x256xf32, #tpu.memory_space<vmem>>, vector<4x256xf32>,
    %c0_28 = arith.constant 0 : index
    %c16 = arith.constant 16 : index
    %65 = vector.load %arg9[%c0_28, %c16] : memref<8x290xf32, #tpu.memory_space<vmem>>, vector<4x256xf32>
    %66 = vector.broadcast %45 : vector<1x256xf32> to vector<4x256xf32>
    %67 = arith.mulf %65, %66 : vector<4x256xf32>
    %c12 = arith.constant 12 : index
    %c0_29 = arith.constant 0 : index
    %68 = vector.load %arg10[%c12, %c0_29] : memref<72x256xf32, #tpu.memory_space<vmem>>, vector<4x256xf32>
    tpu.vector_store %arg10[%c12, %c0_29], %67 {strides = array<i32>} : memref<72x256xf32, #tpu.memory_space<vmem>>, vector<4x256xf32>,
    %c0_30 = arith.constant 0 : index
    %c17_31 = arith.constant 17 : index
    %69 = vector.load %arg9[%c0_30, %c17_31] : memref<8x290xf32, #tpu.memory_space<vmem>>, vector<4x256xf32>
    %c16_32 = arith.constant 16 : index
    %c0_33 = arith.constant 0 : index
    %70 = vector.load %arg10[%c16_32, %c0_33] : memref<72x256xf32, #tpu.memory_space<vmem>>, vector<4x256xf32>
    tpu.vector_store %arg10[%c16_32, %c0_33], %69 {strides = array<i32>} : memref<72x256xf32, #tpu.memory_space<vmem>>, vector<4x256xf32>,
    %c0_34 = arith.constant 0 : index
    %c18 = arith.constant 18 : index
    %71 = vector.load %arg9[%c0_34, %c18] : memref<8x290xf32, #tpu.memory_space<vmem>>, vector<4x256xf32>
    %72 = vector.broadcast %49 : vector<1x256xf32> to vector<4x256xf32>
    %73 = arith.mulf %71, %72 : vector<4x256xf32>
    %c20 = arith.constant 20 : index
    %c0_35 = arith.constant 0 : index
    %74 = vector.load %arg10[%c20, %c0_35] : memref<72x256xf32, #tpu.memory_space<vmem>>, vector<4x256xf32>
    tpu.vector_store %arg10[%c20, %c0_35], %73 {strides = array<i32>} : memref<72x256xf32, #tpu.memory_space<vmem>>, vector<4x256xf32>,
    %c0_36 = arith.constant 0 : index
    %c32 = arith.constant 32 : index
    %75 = vector.load %arg9[%c0_36, %c32] : memref<8x290xf32, #tpu.memory_space<vmem>>, vector<4x256xf32>
    %76 = vector.broadcast %45 : vector<1x256xf32> to vector<4x256xf32>
    %77 = arith.mulf %75, %76 : vector<4x256xf32>
    %c24 = arith.constant 24 : index
    %c0_37 = arith.constant 0 : index
    %78 = vector.load %arg10[%c24, %c0_37] : memref<72x256xf32, #tpu.memory_space<vmem>>, vector<4x256xf32>
    tpu.vector_store %arg10[%c24, %c0_37], %77 {strides = array<i32>} : memref<72x256xf32, #tpu.memory_space<vmem>>, vector<4x256xf32>,
    %c0_38 = arith.constant 0 : index
    %c33 = arith.constant 33 : index
    %79 = vector.load %arg9[%c0_38, %c33] : memref<8x290xf32, #tpu.memory_space<vmem>>, vector<4x256xf32>
    %c28 = arith.constant 28 : index
    %c0_39 = arith.constant 0 : index
    %80 = vector.load %arg10[%c28, %c0_39] : memref<72x256xf32, #tpu.memory_space<vmem>>, vector<4x256xf32>
    tpu.vector_store %arg10[%c28, %c0_39], %79 {strides = array<i32>} : memref<72x256xf32, #tpu.memory_space<vmem>>, vector<4x256xf32>,
    %c0_40 = arith.constant 0 : index
    %c34 = arith.constant 34 : index
    %81 = vector.load %arg9[%c0_40, %c34] : memref<8x290xf32, #tpu.memory_space<vmem>>, vector<4x256xf32>
    %82 = vector.broadcast %49 : vector<1x256xf32> to vector<4x256xf32>
    %83 = arith.mulf %81, %82 : vector<4x256xf32>
    %c32_41 = arith.constant 32 : index
    %c0_42 = arith.constant 0 : index
    %84 = vector.load %arg10[%c32_41, %c0_42] : memref<72x256xf32, #tpu.memory_space<vmem>>, vector<4x256xf32>
    tpu.vector_store %arg10[%c32_41, %c0_42], %83 {strides = array<i32>} : memref<72x256xf32, #tpu.memory_space<vmem>>, vector<4x256xf32>,
    %c0_43 = arith.constant 0 : index
    %c0_44 = arith.constant 0 : index
    %85 = vector.load %arg4[%c0_43, %c0_44] : memref<8x36xf32, #tpu.memory_space<vmem>>, vector<8x36xf32>
    %c0_45 = arith.constant 0 : index
    %c0_46 = arith.constant 0 : index
    %86 = vector.load %arg10[%c0_45, %c0_46] : memref<72x256xf32, #tpu.memory_space<vmem>>, vector<36x256xf32>
    %cst_47 = arith.constant dense<0.000000e+00> : vector<8x256xf32>
    %87 = tpu.matmul %85, %86, %cst_47 {dimension_numbers = #tpu.dot_dimension_numbers<[1], [0], [0], [1], [0, 0, 1, 1], [], []>} : vector<8x36xf32>, vector<36x256xf32>, vector<8x256xf32> -> vector<8x256xf32>
    %c0_48 = arith.constant 0 : index
    %c0_49 = arith.constant 0 : index
    %88 = vector.load %arg5[%c0_48, %c0_49] : memref<8x1xf32, #tpu.memory_space<vmem>>, vector<8x1xf32>
    %89 = vector.broadcast %88 : vector<8x1xf32> to vector<8x256xf32>
    %90 = arith.addf %87, %89 : vector<8x256xf32>
    %cst_50 = arith.constant 5.000000e-01 : f32
    %91 = vector.broadcast %cst_50 : f32 to vector<8x256xf32>
    %92 = arith.mulf %91, %90 : vector<8x256xf32>
    %cst_51 = arith.constant 2.000000e+00 : f32
    %93 = math.sqrt %cst_51 : f32
    %94 = vector.broadcast %93 : f32 to vector<8x256xf32>
    %95 = arith.divf %90, %94 : vector<8x256xf32>
    %96 = math.erf %95 : vector<8x256xf32>
    %cst_52 = arith.constant 1.000000e+00 : f32
    %97 = vector.broadcast %cst_52 : f32 to vector<8x256xf32>
    %98 = arith.addf %97, %96 : vector<8x256xf32>
    %99 = arith.mulf %92, %98 : vector<8x256xf32>
    %c0_53 = arith.constant 0 : index
    %c17_54 = arith.constant 17 : index
    %100 = vector.load %arg9[%c0_53, %c17_54] : memref<8x290xf32, #tpu.memory_space<vmem>>, vector<8x256xf32>
    tpu.vector_store %arg9[%c0_53, %c17_54], %99 {strides = array<i32>} : memref<8x290xf32, #tpu.memory_space<vmem>>, vector<8x256xf32>,
    %c0_55 = arith.constant 0 : index
    %c0_56 = arith.constant 0 : index
    %101 = vector.load %arg9[%c0_55, %c0_56] : memref<8x290xf32, #tpu.memory_space<vmem>>, vector<8x256xf32>
    %102 = vector.broadcast %45 : vector<1x256xf32> to vector<8x256xf32>
    %103 = arith.mulf %101, %102 : vector<8x256xf32>
    %c0_57 = arith.constant 0 : index
    %c0_58 = arith.constant 0 : index
    %104 = vector.load %arg10[%c0_57, %c0_58] : memref<72x256xf32, #tpu.memory_space<vmem>>, vector<8x256xf32>
    tpu.vector_store %arg10[%c0_57, %c0_58], %103 {strides = array<i32>} : memref<72x256xf32, #tpu.memory_space<vmem>>, vector<8x256xf32>,
    %c0_59 = arith.constant 0 : index
    %c1_60 = arith.constant 1 : index
    %105 = vector.load %arg9[%c0_59, %c1_60] : memref<8x290xf32, #tpu.memory_space<vmem>>, vector<8x256xf32>
    %c8_61 = arith.constant 8 : index
    %c0_62 = arith.constant 0 : index
    %106 = vector.load %arg10[%c8_61, %c0_62] : memref<72x256xf32, #tpu.memory_space<vmem>>, vector<8x256xf32>
    tpu.vector_store %arg10[%c8_61, %c0_62], %105 {strides = array<i32>} : memref<72x256xf32, #tpu.memory_space<vmem>>, vector<8x256xf32>,
    %c0_63 = arith.constant 0 : index
    %c2_64 = arith.constant 2 : index
    %107 = vector.load %arg9[%c0_63, %c2_64] : memref<8x290xf32, #tpu.memory_space<vmem>>, vector<8x256xf32>
    %108 = vector.broadcast %49 : vector<1x256xf32> to vector<8x256xf32>
    %109 = arith.mulf %107, %108 : vector<8x256xf32>
    %c16_65 = arith.constant 16 : index
    %c0_66 = arith.constant 0 : index
    %110 = vector.load %arg10[%c16_65, %c0_66] : memref<72x256xf32, #tpu.memory_space<vmem>>, vector<8x256xf32>
    tpu.vector_store %arg10[%c16_65, %c0_66], %109 {strides = array<i32>} : memref<72x256xf32, #tpu.memory_space<vmem>>, vector<8x256xf32>,
    %c0_67 = arith.constant 0 : index
    %c16_68 = arith.constant 16 : index
    %111 = vector.load %arg9[%c0_67, %c16_68] : memref<8x290xf32, #tpu.memory_space<vmem>>, vector<8x256xf32>
    %112 = vector.broadcast %45 : vector<1x256xf32> to vector<8x256xf32>
    %113 = arith.mulf %111, %112 : vector<8x256xf32>
    %c24_69 = arith.constant 24 : index
    %c0_70 = arith.constant 0 : index
    %114 = vector.load %arg10[%c24_69, %c0_70] : memref<72x256xf32, #tpu.memory_space<vmem>>, vector<8x256xf32>
    tpu.vector_store %arg10[%c24_69, %c0_70], %113 {strides = array<i32>} : memref<72x256xf32, #tpu.memory_space<vmem>>, vector<8x256xf32>,
    %c0_71 = arith.constant 0 : index
    %c17_72 = arith.constant 17 : index
    %115 = vector.load %arg9[%c0_71, %c17_72] : memref<8x290xf32, #tpu.memory_space<vmem>>, vector<8x256xf32>
    %c32_73 = arith.constant 32 : index
    %c0_74 = arith.constant 0 : index
    %116 = vector.load %arg10[%c32_73, %c0_74] : memref<72x256xf32, #tpu.memory_space<vmem>>, vector<8x256xf32>
    tpu.vector_store %arg10[%c32_73, %c0_74], %115 {strides = array<i32>} : memref<72x256xf32, #tpu.memory_space<vmem>>, vector<8x256xf32>,
    %c0_75 = arith.constant 0 : index
    %c18_76 = arith.constant 18 : index
    %117 = vector.load %arg9[%c0_75, %c18_76] : memref<8x290xf32, #tpu.memory_space<vmem>>, vector<8x256xf32>
    %118 = vector.broadcast %49 : vector<1x256xf32> to vector<8x256xf32>
    %119 = arith.mulf %117, %118 : vector<8x256xf32>
    %c40 = arith.constant 40 : index
    %c0_77 = arith.constant 0 : index
    %120 = vector.load %arg10[%c40, %c0_77] : memref<72x256xf32, #tpu.memory_space<vmem>>, vector<8x256xf32>
    tpu.vector_store %arg10[%c40, %c0_77], %119 {strides = array<i32>} : memref<72x256xf32, #tpu.memory_space<vmem>>, vector<8x256xf32>,
    %c0_78 = arith.constant 0 : index
    %c32_79 = arith.constant 32 : index
    %121 = vector.load %arg9[%c0_78, %c32_79] : memref<8x290xf32, #tpu.memory_space<vmem>>, vector<8x256xf32>
    %122 = vector.broadcast %45 : vector<1x256xf32> to vector<8x256xf32>
    %123 = arith.mulf %121, %122 : vector<8x256xf32>
    %c48 = arith.constant 48 : index
    %c0_80 = arith.constant 0 : index
    %124 = vector.load %arg10[%c48, %c0_80] : memref<72x256xf32, #tpu.memory_space<vmem>>, vector<8x256xf32>
    tpu.vector_store %arg10[%c48, %c0_80], %123 {strides = array<i32>} : memref<72x256xf32, #tpu.memory_space<vmem>>, vector<8x256xf32>,
    %c0_81 = arith.constant 0 : index
    %c33_82 = arith.constant 33 : index
    %125 = vector.load %arg9[%c0_81, %c33_82] : memref<8x290xf32, #tpu.memory_space<vmem>>, vector<8x256xf32>
    %c56 = arith.constant 56 : index
    %c0_83 = arith.constant 0 : index
    %126 = vector.load %arg10[%c56, %c0_83] : memref<72x256xf32, #tpu.memory_space<vmem>>, vector<8x256xf32>
    tpu.vector_store %arg10[%c56, %c0_83], %125 {strides = array<i32>} : memref<72x256xf32, #tpu.memory_space<vmem>>, vector<8x256xf32>,
    %c0_84 = arith.constant 0 : index
    %c34_85 = arith.constant 34 : index
    %127 = vector.load %arg9[%c0_84, %c34_85] : memref<8x290xf32, #tpu.memory_space<vmem>>, vector<8x256xf32>
    %128 = vector.broadcast %49 : vector<1x256xf32> to vector<8x256xf32>
    %129 = arith.mulf %127, %128 : vector<8x256xf32>
    %c64 = arith.constant 64 : index
    %c0_86 = arith.constant 0 : index
    %130 = vector.load %arg10[%c64, %c0_86] : memref<72x256xf32, #tpu.memory_space<vmem>>, vector<8x256xf32>
    tpu.vector_store %arg10[%c64, %c0_86], %129 {strides = array<i32>} : memref<72x256xf32, #tpu.memory_space<vmem>>, vector<8x256xf32>,
    %c0_87 = arith.constant 0 : index
    %c0_88 = arith.constant 0 : index
    %131 = vector.load %arg6[%c0_87, %c0_88] : memref<8x72xf32, #tpu.memory_space<vmem>>, vector<8x72xf32>
    %c0_89 = arith.constant 0 : index
    %c0_90 = arith.constant 0 : index
    %132 = vector.load %arg10[%c0_89, %c0_90] : memref<72x256xf32, #tpu.memory_space<vmem>>, vector<72x256xf32>
    %cst_91 = arith.constant dense<0.000000e+00> : vector<8x256xf32>
    %133 = tpu.matmul %131, %132, %cst_91 {dimension_numbers = #tpu.dot_dimension_numbers<[1], [0], [0], [1], [0, 0, 1, 1], [], []>} : vector<8x72xf32>, vector<72x256xf32>, vector<8x256xf32> -> vector<8x256xf32>
    %c0_92 = arith.constant 0 : index
    %c0_93 = arith.constant 0 : index
    %134 = vector.load %arg7[%c0_92, %c0_93] : memref<8x1xf32, #tpu.memory_space<vmem>>, vector<8x1xf32>
    %135 = vector.broadcast %134 : vector<8x1xf32> to vector<8x256xf32>
    %136 = arith.addf %133, %135 : vector<8x256xf32>
    %cst_94 = arith.constant 5.000000e-01 : f32
    %137 = vector.broadcast %cst_94 : f32 to vector<8x256xf32>
    %138 = arith.mulf %137, %136 : vector<8x256xf32>
    %cst_95 = arith.constant 2.000000e+00 : f32
    %139 = math.sqrt %cst_95 : f32
    %140 = vector.broadcast %139 : f32 to vector<8x256xf32>
    %141 = arith.divf %136, %140 : vector<8x256xf32>
    %142 = math.erf %141 : vector<8x256xf32>
    %cst_96 = arith.constant 1.000000e+00 : f32
    %143 = vector.broadcast %cst_96 : f32 to vector<8x256xf32>
    %144 = arith.addf %143, %142 : vector<8x256xf32>
    %145 = arith.mulf %138, %144 : vector<8x256xf32>
    %c0_97 = arith.constant 0 : index
    %c0_98 = arith.constant 0 : index
    %c0_99 = arith.constant 0 : index
    %146 = vector.load %arg8[%c0_97, %c0_98, %c0_99] : memref<1x8x256xf32, #tpu.memory_space<vmem>>, vector<1x8x256xf32>
    %147 = vector.shape_cast %146 : vector<1x8x256xf32> to vector<8x256xf32>
    %148 = vector.shape_cast %145 : vector<8x256xf32> to vector<1x8x256xf32>
    tpu.vector_store %arg8[%c0_97, %c0_98, %c0_99], %148 {strides = array<i32>} : memref<1x8x256xf32, #tpu.memory_space<vmem>>, vector<1x8x256xf32>,
    return
  }
  func.func @transform_0(%arg0: i32) -> (i32, i32, i32) {
    %c0_i32 = arith.constant 0 : i32
    %c0_i32_0 = arith.constant 0 : i32
    %c0_i32_1 = arith.constant 0 : i32
    return %arg0, %c0_i32, %c0_i32_0 : i32, i32, i32
  }
  func.func @transform_1(%arg0: i32) -> (i32, i32) {
    %c0_i32 = arith.constant 0 : i32
    %c0_i32_0 = arith.constant 0 : i32
    %c0_i32_1 = arith.constant 0 : i32
    return %c0_i32, %c0_i32_0 : i32, i32
  }
  func.func @transform_2(%arg0: i32) -> (i32, i32) {
    %c0_i32 = arith.constant 0 : i32
    %c0_i32_0 = arith.constant 0 : i32
    %c0_i32_1 = arith.constant 0 : i32
    return %c0_i32, %c0_i32_0 : i32, i32
  }
  func.func @transform_3(%arg0: i32) -> (i32, i32) {
    %c0_i32 = arith.constant 0 : i32
    %c0_i32_0 = arith.constant 0 : i32
    %c0_i32_1 = arith.constant 0 : i32
    return %c0_i32, %c0_i32_0 : i32, i32
  }
  func.func @transform_4(%arg0: i32) -> (i32, i32) {
    %c0_i32 = arith.constant 0 : i32
    %c0_i32_0 = arith.constant 0 : i32
    %c0_i32_1 = arith.constant 0 : i32
    return %c0_i32, %c0_i32_0 : i32, i32
  }
  func.func @transform_5(%arg0: i32) -> (i32, i32) {
    %c0_i32 = arith.constant 0 : i32
    %c0_i32_0 = arith.constant 0 : i32
    %c0_i32_1 = arith.constant 0 : i32
    return %c0_i32, %c0_i32_0 : i32, i32
  }
  func.func @transform_6(%arg0: i32) -> (i32, i32) {
    %c0_i32 = arith.constant 0 : i32
    %c0_i32_0 = arith.constant 0 : i32
    %c0_i32_1 = arith.constant 0 : i32
    return %c0_i32, %c0_i32_0 : i32, i32
  }
  func.func @transform_7(%arg0: i32) -> (i32, i32, i32) {
    %c0_i32 = arith.constant 0 : i32
    %c0_i32_0 = arith.constant 0 : i32
    %c0_i32_1 = arith.constant 0 : i32
    return %arg0, %c0_i32, %c0_i32_0 : i32, i32, i32
  }
}

</mosaic_0001>

<bundles_post_ra>
// kernel: tpu_custom_call.1
= control target key start
LH: loop header
LB: loop body
LE: loop exit
PB: predicated region body
PF: predicated region fallthrough
CT: control target
= control target key end

     0   :  { %s2126_s0 = inlined_call_operand.vmem [shape: f32[2,4,256], index: 0, kind: input, shape index: {}]   ;;  %s2127_s1 = inlined_call_operand.hbm [shape: f32[4,256], index: 1, kind: input, shape index: {}]   ;;  %s2128_s2 = inlined_call_operand.hbm [shape: f32[4,256], index: 2, kind: input, shape index: {}]   ;;  %s2129_s3 = inlined_call_operand.hbm [shape: f32[8,36], index: 3, kind: input, shape index: {}]   ;;  %s2130_s4 = inlined_call_operand.vmem [shape: f32[8,1], index: 4, kind: input, shape index: {}]   ;;  %s2131_s5 = inlined_call_operand.hbm [shape: f32[8,72], index: 5, kind: input, shape index: {}]   ;;  %s2132_s6 = inlined_call_operand.vmem [shape: f32[8,1], index: 6, kind: input, shape index: {}]   ;;  %s2133_s7 = inlined_call_operand.hbm [shape: f32[2,8,256], index: 7, kind: output, shape index: {}]  }
   0x1   :  { %2134 = sst [smem:[#allocation17_spill]] %s2127_s1 }
   0x2   :  { %12 = vsyncpa [#allocation5], 0 }
   0x3   :  { %13 = vsyncpa [#allocation8], 0 }
   0x4   :  { %14 = vsyncpa [#allocation11], 0 }
   0x5   :  { %15 = vsyncpa [#allocation6], 0 }
   0x6   :  { %17 = vsyncpa [#allocation6 + $0x1], 0  ;;  %s1766_s24 = smov 0   ;;  %s1768_s25 = smov 0  }
   0x7   :  { %s1770_s26 = smov 0   ;;  %s1772_s27 = smov 0  }
   0x8 LB: > { %s1787_s28 = sadd.s32 4294967295, %s1702_s27   ;;  %s1325_s29 = sadd.s32 4294967294, %s1702_s27   ;;  %s1702_s27 = sphi %s1772_s27, %s2143_s27   ;;  %s1698_s26 = sphi %s1770_s26, %s2142_s26   ;;  %s1694_s25 = sphi %s1768_s25, %s2141_s25   ;;  %s1690_s24 = sphi %s1766_s24, %s2140_s24  }
   0x9   : > { %s1791_s30 = sadd.s32 1, %s1702_s27   ;;  %s182_s8 = sadd.s32 1, %s1698_s26 }
   0xa   : > { %s179_s9 = ssub.s32 %s1702_s27, %s1791_s30  ;;  %p192_p0 = scmp.ne.s32.totalorder %s1698_s26, %s1694_s25 }
   0xb   : > { %p180_p1 = scmp.eq.s32.totalorder %s179_s9, 0  ;;  %p193_p2 = scmp.eq.s32.totalorder %s1787_s28, 1 }
   0xc   : > { %p198_p3 = scmp.ne.s32.totalorder %s1694_s25, %s1690_s24  ;;  %p199_p4 = scmp.eq.s32.totalorder %s1325_s29, 1 }
   0xd   : > { %s1802_s10 = scalar_select %p180_p1, %s1698_s26, %s182_s8  }
   0xe   : > { %p1804_p5 = por %p193_p2, %p192_p0  ;;  %p1808_p6 = por %p199_p4, %p198_p3 }
   0xf   : > { %p1326_p7 = scmp.ge.s32.totalorder %s1702_s27, 1  ;;  %p206_p8 = scmp.lt.s32.totalorder %s1702_s27, 3 }
  0x10   : > { %p1404_p9 = scmp.eq.s32.totalorder %s1787_s28, 0  ;;  %s230_s16 = sshll.u32 %s2128_s2, 4  ;;  %s231_s16 = int_to_ptr.hbm [resolvable:$true] %s230_s16 }
  0x11   : > { %p1815_p10 = pnand %p1326_p7, %p206_p8  ;;  %s1704_s17 = smov [#allocation7]  }
  0x12   : > { %s232_s18 = sshll.u32 %s1704_s17, 4  ;;  %s2138_s1 = sld [smem:[#allocation17_spill]]  ;;  %s233_s18 = int_to_ptr.vmem [resolvable:$true] %s232_s18 }
  0x13   : > { %p1387_p11 = pneg %p1815_p10  ;;  %s242_s8 = sshll.u32 %s2129_s3, 4  ;;  %s243_s8 = int_to_ptr.hbm [resolvable:$true] %s242_s8 }
  0x14   : > { %s1705_s9 = smov [#allocation4]   ;;  %s257_s19 = sshll.u32 %s2131_s5, 4  ;;  %s258_s19 = int_to_ptr.hbm [resolvable:$true] %s257_s19 }
  0x15   : > { %p1829_p12 = pnand %p1404_p9, %p1387_p11  ;;  %s220_s14 = sshll.u32 %s1705_s9, 4  ;;  %s221_s14 = int_to_ptr.vmem [resolvable:$true] %s220_s14 }
  0x16   : > { %s1706_s20 = smov [#allocation9]   ;;  %s1707_s23 = smov [#allocation10]  }
  0x17   : > { %1393 = dma.hbm_to_vmem [thread:$0]  (!%p1829_p12), %s231_s16, 128, %s233_s18, [#allocation8]  }
  0x18   : > { %s218_s21 = sshll.u32 %s2138_s1, 4  ;;  %s244_s1 = sshll.u32 %s1706_s20, 4  ;;  %s219_s21 = int_to_ptr.hbm [resolvable:$true] %s218_s21  ;;  %s245_s1 = int_to_ptr.vmem [resolvable:$true] %s244_s1 }
  0x19   : > { %1390 = dma.hbm_to_vmem [thread:$0]  (!%p1829_p12), %s219_s21, 128, %s221_s14, [#allocation5]  }
  0x1a   : > { %1396 = dma.hbm_to_vmem [thread:$0]  (!%p1829_p12), %s243_s8, 128, %s245_s1, [#allocation8]  }
  0x1b   : > { %s259_s29 = sshll.u32 %s1707_s23, 4  ;;  %283 = sbr.rel (%p1815_p10) target bundleno = 1503 (0x5df), region = 48  ;;  %s260_s29 = int_to_ptr.vmem [resolvable:$true] %s259_s29 }
  0x1c   : > { %1399 = dma.hbm_to_vmem [thread:$0]  (!%p1829_p12), %s258_s19, 128, %s260_s29, [#allocation11]  }
  0x20   : > { %1673 = dma.done.wait (%p1404_p9), [#allocation5], 128  }
  0x21   : > { %1675 = vsyncadd (%p1404_p9), [#allocation5], 4294967168 }
  0x22   : > { %1677 = dma.done.wait (%p1404_p9), [#allocation8], 256  }
  0x23   : > { %1679 = vsyncadd (%p1404_p9), [#allocation8], 4294967040 }
  0x24   : > { %1681 = dma.done.wait (%p1404_p9), [#allocation11], 128  }
  0x25   : > { %1683 = vsyncadd (%p1404_p9), [#allocation11], 4294967168  ;;  %p331_p13 = scmp.lt.s32.totalorder %s1787_s28, 1  ;;  %vm343_vm0 = vcmask 1043456   ;;  %v1708_v6 = vmov 1024.0   ;;  %v414_v43 = vlaneseq  ;;  %v1709_v48 = vmov 0.0  }
  0x26   : > { %1494 = vrcp.f32 %v1708_v6  ;;  %s1710_s19 = smov 16   ;;  %s1711_s20 = smov 32   ;;  %v410_v56 = vld [vmem:[#allocation4] sm:$0xff]  ;;  %v412_v58 = vld [vmem:[#allocation7] sm:$0xff]  ;;  %vm453_vm9 = vcmask 138240   ;;  %vm455_vm10 = vcmask 277640  }
  0x27   : > { %s332_s1 = scalar_select %p331_p13, %s1787_s28, 1  ;;  %v415_v44 = vand.u32 127, %v414_v43  ;;  %454 = vst.msk [vmem:[#allocation2] sm:$0xff] %vm453_vm9, %v1709_v48  ;;  %vm469_vm11 = vcmask 1043592   ;;  %vm472_vm12 = vcmask 134144   ;;  %vm631_vm13 = vcmask 261120  }
  0x28   : > { %s1712_s23 = smov 34   ;;  %s1715_s16 = smov 17   ;;  %456 = vst.msk [vmem:[#allocation2 + $0x10] sm:$0xff] %vm455_vm10, %v1709_v48  ;;  %vm684_vm14 = vcmask 277504   ;;  %vm511_vm15 = vcmask 15360   ;;  %vm564_vm10 = vcmask 916480  }
  0x29   : > { %s1359_s13 = sshll.u32 %s332_s1, 3  ;;  %v416_v45 = vadd.s32 128, %v415_v44  ;;  %v421_v46 = vand.u32 15, %v415_v44  ;;  %s1713_s1 = smov 18  }
  0x2a   : > { %s335_s21 = scalar_lea.vmem %s2126_s0, %s1359_s13  ;;  %s1714_s13 = smov 2  }
  0x2b   : > { %v336_v0 = vld [vmem:[%s335_s21] sm:$0xff]  ;;  %v428_v47 = vand.u32 15, %v416_v45  ;;  %vm441_vm5 = vcmp.ne.s32.totalorder %v421_v46, 0  ;;  %vm447_vm7 = vcmp.ne.s32.totalorder %v421_v46, 15  ;;  %s1716_s18 = smov 111   ;;  %s1717_s21 = smov 96  }
  0x2c   : > { %338 = vst [vmem:[#allocation1] ss:$2 sm:$0xff] %v336_v0  ;;  %v1495_v7 = vpop.eup %1494  ;;  %v1870_v49 = vsel %vm441_vm5, 1.0, %v1709_v48  ;;  %v1342_v52 = vsel %vm447_vm7, 1.0, %v1709_v48  ;;  %vm648_vm5 = vcmask 785408   ;;  %vm528_vm7 = vcmask 1031168  }
  0x2d   : > { %v357_v8 = vmul.f32 1024.0, %v1495_v7  ;;  %vm361_vm1 = vweird.f32 %v1495_v7  ;;  %vm442_vm6 = vcmp.ne.s32.totalorder %v428_v47, 0  ;;  %vm448_vm8 = vcmp.ne.s32.totalorder %v428_v47, 15 }
  0x2e   : > { %v1872_v50 = vsel %vm442_vm6, 1.0, %v1709_v48  ;;  %v1343_v53 = vsel %vm448_vm8, 1.0, %v1709_v48  ;;  %vm670_vm6 = vcmask 777216   ;;  %vm617_vm8 = vcmask 900096  }
  0x2f   : > { %v358_v9 = vsub.f32 1.0, %v357_v8  ;;  %v1482_v51 = vpack.i.bf16 %v1872_v50, %v1870_v49  ;;  %v1467_v54 = vpack.i.bf16 %v1343_v53, %v1342_v52 }
  0x31   : > { %v359_v13 = vmul.f32 %v1495_v7, %v358_v9  ;;  %1483 = vrot.lane.b32.xlu1 %v1482_v51, %s1710_s19  ;;  %1468 = vrot.lane.b32.xlu2 %v1467_v54, %s1712_s23  ;;  %s1648_s23 = scalar_lea.hbm %s2133_s7, 32 }
  0x33   : > { %v339_v1 = vld.sshfl [vmem:[#allocation1] sm:$0xff pattern:$0x75316420]  ;;  %v340_v2 = vld.sshfl [vmem:[#allocation1 + $0x8] sm:$0xff pattern:$0x75316420]  ;;  %v360_v16 = vadd.f32 %v1495_v7, %v359_v13 }
  0x34   : > { %v344_v3 = vsel %vm343_vm0, %v339_v1, 0.0  ;;  %v345_v4 = vsel %vm343_vm0, %v340_v2, 0.0 }
  0x35   : > { %v346_v5 = vadd.f32 %v345_v4, %v344_v3  ;;  %v362_v19 = vsel %vm361_vm1, %v1495_v7, %v360_v16  ;;  %vm597_vm1 = vcmask 146432  }
  0x37   : > { %347 = vadd.xlane.f32.xlu0 %v346_v5 }
  0x39   : > { %1473 = vrot.lane.b32.xlu2 %v1467_v54, %s1713_s1  ;;  %s328_s1 = sand.u32 1, %s1694_s25  }
  0x41   : > { %1488 = vrot.lane.b32.xlu2 %v1467_v54, %s1714_s13  ;;  %s1337_s13 = sshll.u32 %s328_s1, 4 }
  0x8b   : > { %v1469_v1 = vpop.permute.xlu2 %1468 }
  0xa3   : > { %v1879_v63 = vpop.permute.xlu1 %1483 }
  0xa4   : > { %v1940_v53 = vunpack.i.h.bf16 %v1879_v63  ;;  %v1943_v54 = vunpack.i.l.bf16 %v1879_v63 }
  0xaa   : > { %v348_v10 = vpop.xlane.xlu0 %347 }
  0xab   : > { %v349_v11 = vrot.slane %v348_v10, 4 }
  0xad   : > { %v350_v12 = vadd.f32 %v349_v11, %v348_v10  ;;  %v1474_v10 = vpop.permute.xlu2 %1473 }
  0xaf   : > { %v351_v14 = vrot.slane %v350_v12, 2 }
  0xb1   : > { %v352_v15 = vadd.f32 %v351_v14, %v350_v12 }
  0xb3   : > { %v353_v17 = vrot.slane %v352_v15, 1 }
  0xb5   : > { %v354_v18 = vadd.f32 %v353_v17, %v352_v15  ;;  %v1893_v17 = vunpack.i.l.bf16 %v1469_v1 }
  0xb7   : > { %1361 = vpush %v354_v18 }
  0xb8   : > { %1363 = vpush %v362_v19 }
  0xe8   : > { %s1362_s22 = spop %1361 }
  0xe9   : > { %s1364_s8 = spop %1363 }
  0xea   : > { %s364_s9 = smul.f32 %s1364_s8, %s1362_s22  ;;  %s1718_s22 = smov 94  }
  0xec   : > { %v365_v20 = vstv %s364_s9  ;;  %s1720_s9 = smov 126  }
  0xed   : > { %v366_v21 = vsub.f32 %v336_v0, %v365_v20 }
  0xef   : > { %v367_v22 = vmul.f32 %v366_v21, %v366_v21 }
  0xf1   : > { %369 = vst [vmem:[#allocation1] ss:$2 sm:$0xff] %v367_v22 }
  0xf8   : > { %v370_v23 = vld.sshfl [vmem:[#allocation1] sm:$0xff pattern:$0x75316420]  ;;  %v371_v24 = vld.sshfl [vmem:[#allocation1 + $0x8] sm:$0xff pattern:$0x75316420] }
  0xf9   : > { %v374_v25 = vsel %vm343_vm0, %v370_v23, 0.0  ;;  %v375_v26 = vsel %vm343_vm0, %v371_v24, 0.0  ;;  %v1489_v24 = vpop.permute.xlu2 %1488 }
  0xfa   : > { %v376_v27 = vadd.f32 %v375_v26, %v374_v25  ;;  %v1904_v26 = vunpack.i.h.bf16 %v1469_v1 }
  0xfc   : > { %377 = vadd.xlane.f32.xlu0 %v376_v27  ;;  %v1906_v27 = vunpack.i.l.bf16 %v1489_v24 }
 0x110   : > { %1478 = vrot.lane.b32.xlu0 %v1482_v51, %s1711_s20 }
 0x16f   : > { %v378_v28 = vpop.xlane.xlu0 %377 }
 0x170   : > { %v379_v29 = vrot.slane %v378_v28, 4 }
 0x172   : > { %v380_v30 = vadd.f32 %v379_v29, %v378_v28 }
 0x174   : > { %v381_v31 = vrot.slane %v380_v30, 2 }
 0x176   : > { %v382_v32 = vadd.f32 %v381_v31, %v380_v30 }
 0x178   : > { %v383_v33 = vrot.slane %v382_v32, 1 }
 0x17a   : > { %v384_v34 = vadd.f32 %v383_v33, %v382_v32 }
 0x17c   : > { %1365 = vpush %v384_v34  ;;  %v1910_v34 = vunpack.i.h.bf16 %v1489_v24 }
 0x182   : > { %v1479_v2 = vpop.permute.xlu0 %1478 }
 0x183   : > { %v1883_v6 = vunpack.i.l.bf16 %v1479_v2  ;;  %v1887_v13 = vunpack.i.h.bf16 %v1479_v2 }
 0x1ad   : > { %s1366_s14 = spop %1365 }
 0x1ae   : > { %s394_s15 = smul.f32 %s1366_s14, %s1364_s8  ;;  %s1719_s8 = smov 95  }
 0x1af   : > { %s1721_s14 = smov 110  }
 0x1b0   : > { %s395_s17 = sadd.f32 1e-05, %s394_s15  ;;  %s1722_s15 = smov 112  }
 0x1b2   : > { %v396_v35 = vstv %s395_s17  ;;  %s1723_s17 = smov 127  }
 0x1b3   : > { %1496 = vrsqrt.f32 %v396_v35  ;;  %vm403_vm3 = vweird.f32 %v396_v35 }
 0x1b9   : > { %v1497_v36 = vpop.eup %1496 }
 0x1ba   : > { %v398_v37 = vmul.f32 %v1497_v36, %v396_v35  ;;  %vm404_vm2 = vweird.f32 %v1497_v36 }
 0x1bb   : > { %vm405_vm4 = vmor %vm403_vm3, %vm404_vm2  ;;  %vm544_vm2 = vcmask 130048   ;;  %vm583_vm3 = vcmask 908288  }
 0x1bc   : > { %v399_v38 = vmul.f32 %v1497_v36, %v398_v37  ;;  %v1917_v37 = vsel %vm684_vm14, %v1893_v17, %v1904_v26 }
 0x1be   : > { %v400_v39 = vmul.f32 0.5, %v399_v38  ;;  %v1919_v38 = vunpack.i.h.bf16 %v1474_v10 }
 0x1c0   : > { %v401_v40 = vsub.f32 1.5, %v400_v39 }
 0x1c2   : > { %v402_v41 = vmul.f32 %v1497_v36, %v401_v40  ;;  %v1923_v40 = vsel %vm511_vm15, %v1906_v27, %v1910_v34 }
 0x1c4   : > { %v406_v42 = vsel %vm405_vm4, %v1497_v36, %v402_v41  ;;  %v1925_v41 = vunpack.i.l.bf16 %v1474_v10  ;;  %vm701_vm4 = vcmask 769024  }
 0x1c5   : > { %1367 = vpush %v406_v42 }
 0x1c6   : > { %v1934_v47 = vsel %vm597_vm1, %v1925_v41, %v1919_v38 }
 0x1f6   : > { %s1368_s29 = spop %1367 }
 0x1f7   : > { %v408_v55 = vstv %s1368_s29 }
 0x1f8   : > { %v409_v57 = vmul.f32 %v408_v55, %v366_v21  ;;  %v1897_v21 = vsel %vm631_vm13, %v1883_v6, %v1887_v13 }
 0x1fa   : > { %v411_v59 = vmul.f32 %v410_v56, %v409_v57 }
 0x1fc   : > { %v413_v60 = vadd.f32 %v412_v58, %v411_v59 }
 0x1fe   : > { %458 = vst [vmem:[#allocation1] ss:$2 sm:$0xff] %v413_v60 }
 0x205   : > { %v459_v61 = vld.sshfl [vmem:[#allocation1] sm:$0xff pattern:$0x75316420]  ;;  %v460_v62 = vld.sshfl [vmem:[#allocation1 + $0x8] sm:$0xff pattern:$0x75316420] }
 0x206   : > { %461 = vrot.lane.b32.xlu1 %v459_v61, %s1715_s16  ;;  %v1951_v61 = vsel %vm544_vm2, %v1943_v54, %v1940_v53 }
 0x20e   : > { %463 = vrot.lane.b32.xlu1 %v460_v62, %s1715_s16 }
 0x278   : > { %v462_v0 = vpop.permute.xlu1 %461 }
 0x279   : > { %470 = vst.msk [vmem:[#allocation2] sm:$0xf] %vm469_vm11, %v462_v0  ;;  %vm725_vm11 = vcmask 293888  }
 0x280   : > { %v464_v3 = vpop.permute.xlu1 %463  ;;  %v571_v4 = vld [vmem:[#allocation2] sm:$0xf] }
 0x281   : > { %v465_v5 = vsel %vm453_vm9, %v462_v0, %v464_v3  ;;  %473 = vst.msk [vmem:[#allocation2 + $0x10] sm:$0xf] %vm472_vm12, %v464_v3  ;;  %577 = vrot.lane.b32.xlu2 %v571_v4, %s1716_s18  ;;  %v474_v7 = vld [vmem:[#allocation2] sm:$0xf] }
 0x282   : > { %471 = vst [vmem:[#allocation2 + $0x8] sm:$0xf] %v465_v5  ;;  %v624_v8 = vld [vmem:[#allocation2] sm:$0xf]  ;;  %v476_v9 = vmul.f32 %v1870_v49, %v474_v7 }
 0x283   : > { %v636_v11 = vmul.f32 %v1883_v6, %v624_v8  ;;  %v677_v18 = vld [vmem:[#allocation2] sm:$0xf] }
 0x284   : > { %478 = vst [vmem:[#allocation3] sm:$0xf] %v476_v9  ;;  %v655_v19 = vld [vmem:[#allocation2] sm:$0xf]  ;;  %v689_v22 = vmul.f32 %v1893_v17, %v677_v18 }
 0x285   : > { %v661_v23 = vrot.slane %v655_v19, 4  ;;  %v502_v29 = vld [vmem:[#allocation2] sm:$0xf] }
 0x286   : > { %v516_v32 = vmul.f32 %v1906_v27, %v502_v29  ;;  %v590_v45 = vld [vmem:[#allocation2] sm:$0xf] }
 0x287   : > { %v602_v48 = vmul.f32 %v1925_v41, %v590_v45  ;;  %v535_v58 = vld [vmem:[#allocation2] sm:$0xf] }
 0x288   : > { %v573_v12 = vld [vmem:[#allocation2 + $0x10] sm:$0xf]  ;;  %v549_v60 = vmul.f32 %v1943_v54, %v535_v58  ;;  %v480_v5 = vld [vmem:[#allocation2] sm:$0xf] }
 0x289   : > { %v475_v14 = vld [vmem:[#allocation2 + $0x8] sm:$0xf]  ;;  %581 = vrot.lane.b32.xlu1 %v573_v12, %s1716_s18  ;;  %642 = vrot.lane.b32.xlu2 %v636_v11, %s1717_s21  ;;  %v679_v28 = vld [vmem:[#allocation2 + $0x10] sm:$0xf]  ;;  %v608_v56 = vrot.slane %v602_v48, 4  ;;  %v486_v9 = vrot.slane %v480_v5, 4 }
 0x28a   : > { %v572_v15 = vld [vmem:[#allocation2 + $0x8] sm:$0xf]  ;;  %v477_v16 = vmul.f32 %v1872_v50, %v475_v14  ;;  %v691_v31 = vmul.f32 %v1904_v26, %v679_v28  ;;  %v626_v35 = vld [vmem:[#allocation2 + $0x10] sm:$0xf]  ;;  %v555_v1 = vrot.slane %v549_v60, 4  ;;  %v1724_v5 = vmov 0  }
 0x28b   : > { %579 = vrot.lane.b32.xlu0 %v572_v15, %s1716_s18  ;;  %v625_v20 = vld [vmem:[#allocation2 + $0x8] sm:$0xf]  ;;  %v638_v42 = vmul.f32 %v1887_v13, %v626_v35  ;;  %v657_v51 = vld [vmem:[#allocation2 + $0x10] sm:$0xf]  ;;  %1492 = vset.pattern.permute.xlu2 %v1724_v5 }
 0x28c   : > { %479 = vst [vmem:[#allocation3 + $0x38] sm:$0xf] %v477_v16  ;;  %v637_v25 = vmul.f32 %v1897_v21, %v625_v20  ;;  %v656_v30 = vld [vmem:[#allocation2 + $0x8] sm:$0xf]  ;;  %v663_v55 = vrot.slane %v657_v51, 4  ;;  %1493 = vset.pattern.permute.xlu0 %v1724_v5 }
 0x28d   : > { %v662_v33 = vrot.slane %v656_v30, 4  ;;  %v678_v36 = vld [vmem:[#allocation2 + $0x8] sm:$0xf]  ;;  %v504_v62 = vld [vmem:[#allocation2 + $0x10] sm:$0xf] }
 0x28e   : > { %v503_v39 = vld [vmem:[#allocation2 + $0x8] sm:$0xf]  ;;  %v690_v43 = vmul.f32 %v1917_v37, %v678_v36  ;;  %v518_v0 = vmul.f32 %v1910_v34, %v504_v62  ;;  %v592_v3 = vld [vmem:[#allocation2 + $0x10] sm:$0xf] }
 0x28f   : > { %v517_v44 = vmul.f32 %v1923_v40, %v503_v39  ;;  %v591_v46 = vld [vmem:[#allocation2 + $0x8] sm:$0xf]  ;;  %v604_v4 = vmul.f32 %v1919_v38, %v592_v3  ;;  %v537_v11 = vld [vmem:[#allocation2 + $0x10] sm:$0xf] }
 0x290   : > { %v603_v52 = vmul.f32 %v1934_v47, %v591_v46  ;;  %v536_v59 = vld [vmem:[#allocation2 + $0x8] sm:$0xf]  ;;  %v551_v12 = vmul.f32 %v1940_v53, %v537_v11  ;;  %v482_v15 = vld [vmem:[#allocation2 + $0x10] sm:$0xf] }
 0x291   : > { %695 = vrot.lane.b32.xlu1 %v689_v22, %s1718_s22  ;;  %664 = vrot.lane.b32.xlu2 %v661_v23, %s1719_s8  ;;  %v550_v63 = vmul.f32 %v1951_v61, %v536_v59  ;;  %v481_v7 = vld [vmem:[#allocation2 + $0x8] sm:$0xf]  ;;  %v610_v8 = vrot.slane %v604_v4, 4  ;;  %v488_v16 = vrot.slane %v482_v15, 4  ;;  %v719_v4 = vld [vmem:[%s2130_s4] sm:$0xff] }
 0x292   : > { %v609_v57 = vrot.slane %v603_v52, 4  ;;  %v487_v10 = vrot.slane %v481_v7, 4  ;;  %v557_v14 = vrot.slane %v551_v12, 4 }
 0x293   : > { %644 = vrot.lane.b32.xlu0 %v637_v25, %s1717_s21  ;;  %v556_v2 = vrot.slane %v550_v63, 4 }
 0x299   : > { %699 = vrot.lane.b32.xlu1 %v691_v31, %s1718_s22  ;;  %522 = vrot.lane.b32.xlu2 %v516_v32, %s1720_s9 }
 0x29b   : > { %666 = vrot.lane.b32.xlu0 %v662_v33, %s1719_s8 }
 0x2a1   : > { %646 = vrot.lane.b32.xlu1 %v638_v42, %s1717_s21  ;;  %697 = vrot.lane.b32.xlu2 %v690_v43, %s1718_s22 }
 0x2a3   : > { %524 = vrot.lane.b32.xlu0 %v517_v44, %s1720_s9 }
 0x2a9   : > { %668 = vrot.lane.b32.xlu1 %v663_v55, %s1719_s8  ;;  %611 = vrot.lane.b32.xlu2 %v608_v56, %s1721_s14 }
 0x2ab   : > { %613 = vrot.lane.b32.xlu0 %v609_v57, %s1721_s14 }
 0x2b1   : > { %526 = vrot.lane.b32.xlu1 %v518_v0, %s1720_s9  ;;  %558 = vrot.lane.b32.xlu2 %v555_v1, %s1722_s15 }
 0x2b3   : > { %560 = vrot.lane.b32.xlu0 %v556_v2, %s1722_s15 }
 0x2b9   : > { %615 = vrot.lane.b32.xlu1 %v610_v8, %s1721_s14  ;;  %489 = vrot.lane.b32.xlu2 %v486_v9, %s1723_s17 }
 0x2bb   : > { %491 = vrot.lane.b32.xlu0 %v487_v10, %s1723_s17 }
 0x2c1   : > { %562 = vrot.lane.b32.xlu1 %v557_v14, %s1722_s15  ;;  %722 = vperm.xlu2 %1492, %v719_v4  }
 0x2c9   : > { %493 = vrot.lane.b32.xlu1 %v488_v16, %s1723_s17 }
 0x2db   : > { %v578_v18 = vpop.permute.xlu2 %577 }
 0x2e3   : > { %v643_v19 = vpop.permute.xlu2 %642 }
 0x2eb   : > { %v665_v20 = vpop.permute.xlu2 %664 }
 0x2f3   : > { %v523_v22 = vpop.permute.xlu2 %522 }
 0x2fb   : > { %v582_v23 = vpop.permute.xlu1 %581  ;;  %v698_v29 = vpop.permute.xlu2 %697 }
 0x2fd   : > { %v580_v24 = vpop.permute.xlu0 %579 }
 0x2fe   : > { %v584_v25 = vsel %vm583_vm3, %v578_v18, %v580_v24  ;;  %v585_v28 = vsel %vm583_vm3, %v580_v24, %v582_v23  ;;  %v708_v18 = vld [vmem:[#allocation9] sm:$0xff] }
 0x2ff   : > { %588 = vst [vmem:[#allocation3 + $0x20] sm:$0xf] %v584_v25  ;;  %v1725_v25 = vmov 1.4142135  }
 0x300   : > { %589 = vst [vmem:[#allocation3 + $0x8] sm:$0xf] %v585_v28  ;;  %1498 = vrcp.f32 %v1725_v25 }
 0x303   : > { %v696_v30 = vpop.permute.xlu1 %695  ;;  %v612_v55 = vpop.permute.xlu2 %611 }
 0x304   : > { %v702_v31 = vsel %vm701_vm4, %v696_v30, %v698_v29 }
 0x305   : > { %v645_v32 = vpop.permute.xlu0 %644  ;;  %706 = vst [vmem:[#allocation3 + $0x88] sm:$0xf] %v702_v31 }
 0x306   : > { %v649_v33 = vsel %vm648_vm5, %v643_v19, %v645_v32  ;;  %v1499_v28 = vpop.eup %1498 }
 0x307   : > { %653 = vst [vmem:[#allocation3 + $0x70] sm:$0xf] %v649_v33  ;;  %vm782_vm12 = vweird.f32 %v1499_v28 }
 0x30b   : > { %v700_v35 = vpop.permute.xlu1 %699  ;;  %v559_v60 = vpop.permute.xlu2 %558 }
 0x30c   : > { %v703_v36 = vsel %vm701_vm4, %v698_v29, %v700_v35  ;;  %v717_v42 = vld [vmem:[#allocation3 + $0x88] sm:$0xf]  ;;  %v778_v29 = vmul.f32 1.4142135, %v1499_v28 }
 0x30d   : > { %v667_v39 = vpop.permute.xlu0 %666  ;;  %707 = vst [vmem:[#allocation3 + $0x40] sm:$0xf] %v703_v36  ;;  %1344 = vmatpush.msk.msra.mxu0 %vm343_vm0, %v717_v42 }
 0x30e   : > { %v671_v43 = vsel %vm670_vm6, %v665_v20, %v667_v39  ;;  %v779_v30 = vsub.f32 1.0, %v778_v29 }
 0x30f   : > { %675 = vst [vmem:[#allocation3 + $0x70] sm:$0xf0] %v671_v43 }
 0x310   : > { %v780_v31 = vmul.f32 %v1499_v28, %v779_v30 }
 0x313   : > { %v647_v44 = vpop.permute.xlu1 %646  ;;  %v490_v8 = vpop.permute.xlu2 %489 }
 0x314   : > { %v650_v45 = vsel %vm648_vm5, %v645_v32, %v647_v44  ;;  %v718_v48 = vld [vmem:[#allocation3 + $0x40] sm:$0xf]  ;;  %v781_v32 = vadd.f32 %v1499_v28, %v780_v31 }
 0x315   : > { %v525_v46 = vpop.permute.xlu0 %524  ;;  %654 = vst [vmem:[#allocation3 + $0x80] sm:$0xf] %v650_v45  ;;  %1346 = vmatpush.msk.msra.mxu1 %vm343_vm0, %v718_v48  ;;  %vm495_vm0 = vcmask 1039360  }
 0x316   : > { %v529_v51 = vsel %vm528_vm7, %v523_v22, %v525_v46  ;;  %v715_v52 = vld [vmem:[#allocation3 + $0x70] sm:$0xff]  ;;  %v1986_v36 = vsel %vm782_vm12, %v1499_v28, %v781_v32 }
 0x317   : > { %533 = vst [vmem:[#allocation3 + $0x78] sm:$0xf] %v529_v51  ;;  %747 = vmatpush.msra.mxu0 %v715_v52 }
 0x31b   : > { %v669_v56 = vpop.permute.xlu1 %668  ;;  %v723_v33 = vpop.permute.xlu2 %722 }
 0x31c   : > { %v672_v57 = vsel %vm670_vm6, %v667_v39, %v669_v56 }
 0x31d   : > { %v614_v58 = vpop.permute.xlu0 %613  ;;  %676 = vst [vmem:[#allocation3 + $0x80] sm:$0xf0] %v672_v57 }
 0x31e   : > { %v618_v59 = vsel %vm617_vm8, %v612_v55, %v614_v58 }
 0x31f   : > { %622 = vst [vmem:[#allocation3 + $0x20] sm:$0xf0] %v618_v59 }
 0x323   : > { %v527_v62 = vpop.permute.xlu1 %526 }
 0x324   : > { %v530_v63 = vsel %vm528_vm7, %v525_v46, %v527_v62  ;;  %v716_v1 = vld [vmem:[#allocation3 + $0x80] sm:$0xff] }
 0x325   : > { %v561_v0 = vpop.permute.xlu0 %560  ;;  %534 = vst [vmem:[#allocation3 + $0x58] sm:$0xf] %v530_v63  ;;  %767 = vmatpush.msra.mxu1 %v716_v1 }
 0x326   : > { %v565_v2 = vsel %vm564_vm10, %v559_v60, %v561_v0  ;;  %v713_v3 = vld [vmem:[#allocation3 + $0x20] sm:$0xff] }
 0x327   : > { %569 = vst [vmem:[#allocation3 + $0x78] sm:$0xf0] %v565_v2  ;;  %748 = vmatpush.msra.mxu0 %v713_v3 }
 0x32b   : > { %v616_v7 = vpop.permute.xlu1 %615 }
 0x32c   : > { %v619_v9 = vsel %vm617_vm8, %v614_v58, %v616_v7 }
 0x32d   : > { %v492_v10 = vpop.permute.xlu0 %491  ;;  %623 = vst [vmem:[#allocation3 + $0x8] sm:$0xf0] %v619_v9 }
 0x32e   : > { %v496_v11 = vsel %vm495_vm0, %v490_v8, %v492_v10  ;;  %v711_v12 = vld [vmem:[#allocation3 + $0x78] sm:$0xff] }
 0x32f   : > { %500 = vst [vmem:[#allocation3] sm:$0xf0] %v496_v11  ;;  %749 = vmatpush.msra.mxu0 %v711_v12 }
 0x333   : > { %v563_v14 = vpop.permute.xlu1 %562 }
 0x334   : > { %v566_v15 = vsel %vm564_vm10, %v561_v0, %v563_v14  ;;  %v714_v16 = vld [vmem:[#allocation3 + $0x8] sm:$0xff] }
 0x335   : > { %570 = vst [vmem:[#allocation3 + $0x58] sm:$0xf0] %v566_v15  ;;  %768 = vmatpush.msra.mxu1 %v714_v16 }
 0x336   : > { %v709_v19 = vld [vmem:[#allocation3] sm:$0xff] }
 0x337   : > { %750 = vmatpush.msra.mxu0 %v709_v19 }
 0x338   : > { %1345 = vmatmul.msk.f32.vlgmr.msra.gmra.mxu0 %vm725_vm11, %v708_v18 }
 0x33b   : > { %v494_v20 = vpop.permute.xlu1 %493 }
 0x33c   : > { %v497_v22 = vsel %vm495_vm0, %v492_v10, %v494_v20  ;;  %v712_v23 = vld [vmem:[#allocation3 + $0x58] sm:$0xff] }
 0x33d   : > { %501 = vst [vmem:[#allocation3 + $0x38] sm:$0xf0] %v497_v22  ;;  %769 = vmatpush.msra.mxu1 %v712_v23 }
 0x344   : > { %v710_v24 = vld [vmem:[#allocation3 + $0x38] sm:$0xff] }
 0x345   : > { %770 = vmatpush.msra.mxu1 %v710_v24 }
 0x346   : > { %1347 = vmatmul.msk.f32.vlgmr.msra.gmra.mxu1 %vm725_vm11, %v708_v18 }
 0x3b5   : > { %v752_v35 = vpop.f32.mrf.mxu0 }
 0x3b6   : > { %v1988_v39 = vadd.f32 %v752_v35, %v723_v33 }
 0x3b8   : > { %v784_v42 = vmul.f32 %v1986_v36, %v1988_v39 }
 0x3ba   : > { %v786_v43 = vmul.f32 %v784_v42, %v784_v42 }
 0x3bc   : > { %v787_v44 = vmin.f32 %v786_v43, 16.0 }
 0x3be   : > { %v788_v45 = vmul.f32 2.1237322e-06, %v787_v44  ;;  %v799_v46 = vmul.f32 3.8918573e-05, %v787_v44 }
 0x3c0   : > { %v789_v48 = vadd.f32 0.00028619796, %v788_v45  ;;  %v800_v51 = vadd.f32 0.001143296, %v799_v46 }
 0x3c2   : > { %v790_v52 = vmul.f32 %v789_v48, %v787_v44  ;;  %v801_v55 = vmul.f32 %v800_v51, %v787_v44 }
 0x3c3   : > { %v772_v58 = vpop.f32.mrf.mxu1 }
 0x3c4   : > { %v791_v56 = vadd.f32 0.0036580483, %v790_v52  ;;  %v802_v57 = vadd.f32 0.014752088, %v801_v55  ;;  %v1992_v59 = vadd.f32 %v772_v58, %v723_v33 }
 0x3c6   : > { %v803_v60 = vmul.f32 %v802_v57, %v787_v44  ;;  %v1996_v62 = vmul.f32 %v1986_v36, %v1992_v59  ;;  %v792_v63 = vmul.f32 %v791_v56, %v787_v44 }
 0x3c8   : > { %v804_v0 = vadd.f32 0.112945676, %v803_v60  ;;  %v826_v1 = vmul.f32 %v1996_v62, %v1996_v62  ;;  %v793_v4 = vadd.f32 0.05243302, %v792_v63 }
 0x3ca   : > { %v805_v2 = vmul.f32 %v804_v0, %v787_v44  ;;  %v827_v3 = vmin.f32 %v826_v1, 16.0  ;;  %v794_v12 = vmul.f32 %v793_v4, %v787_v44 }
 0x3cc   : > { %v806_v5 = vadd.f32 0.4994258, %v805_v2  ;;  %v828_v7 = vmul.f32 2.1237322e-06, %v827_v3  ;;  %v839_v8 = vmul.f32 3.8918573e-05, %v827_v3 }
 0x3cd   : > { %v795_v19 = vadd.f32 0.18741608, %v794_v12  ;;  %v775_v2 = vmul.f32 0.5, %v1988_v39 }
 0x3ce   : > { %v807_v9 = vmul.f32 %v806_v5, %v787_v44  ;;  %v829_v10 = vadd.f32 0.00028619796, %v828_v7  ;;  %v840_v11 = vadd.f32 0.001143296, %v839_v8 }
 0x3cf   : > { %v796_v25 = vmul.f32 %v795_v19, %v787_v44 }
 0x3d0   : > { %v808_v14 = vadd.f32 1.0, %v807_v9  ;;  %v830_v15 = vmul.f32 %v829_v10, %v827_v3  ;;  %v841_v16 = vmul.f32 %v840_v11, %v827_v3 }
 0x3d1   : > { %v797_v33 = vadd.f32 1.1283791, %v796_v25 }
 0x3d2   : > { %1500 = vrcp.f32 %v808_v14  ;;  %v842_v18 = vadd.f32 0.014752088, %v841_v16  ;;  %v831_v20 = vadd.f32 0.0036580483, %v830_v15  ;;  %v820_v35 = vand.u32 2147483648, %v808_v14 }
 0x3d3   : > { %v818_v46 = vand.u32 2147483647, %v808_v14  ;;  %vm814_vm14 = vweird.f32 %v808_v14  ;;  %v798_v57 = vmul.f32 %v797_v33, %v784_v42 }
 0x3d4   : > { %v843_v22 = vmul.f32 %v842_v18, %v827_v3  ;;  %v832_v28 = vmul.f32 %v831_v20, %v827_v3  ;;  %v821_v55 = vor.u32 1.1754944e-38, %v820_v35  ;;  %v776_v20 = vmul.f32 0.5, %v1992_v59 }
 0x3d5   : > { %vm819_vm1 = vcmp.eq.f32.partialorder %v818_v46, 8.507059e+37 }
 0x3d6   : > { %v844_v23 = vadd.f32 0.112945676, %v843_v22  ;;  %v833_v43 = vadd.f32 0.05243302, %v832_v28 }
 0x3d8   : > { %v1501_v24 = vpop.eup %1500  ;;  %v845_v30 = vmul.f32 %v844_v23, %v827_v3  ;;  %v834_v56 = vmul.f32 %v833_v43, %v827_v3 }
 0x3d9   : > { %v810_v29 = vmul.f32 %v1501_v24, %v808_v14  ;;  %vm815_vm13 = vweird.f32 %v1501_v24 }
 0x3da   : > { %v846_v32 = vadd.f32 0.4994258, %v845_v30  ;;  %vm816_vm15 = vmor %vm814_vm14, %vm815_vm13  ;;  %v835_v63 = vadd.f32 0.18741608, %v834_v56  ;;  %vm880_vm14 = vcmask 1047688  }
 0x3db   : > { %v811_v31 = vsub.f32 1.0, %v810_v29 }
 0x3dc   : > { %v847_v48 = vmul.f32 %v846_v32, %v827_v3  ;;  %v836_v5 = vmul.f32 %v835_v63, %v827_v3 }
 0x3dd   : > { %v812_v45 = vmul.f32 %v1501_v24, %v811_v31 }
 0x3de   : > { %v848_v52 = vadd.f32 1.0, %v847_v48  ;;  %v837_v11 = vadd.f32 1.1283791, %v836_v5 }
 0x3df   : > { %v813_v51 = vadd.f32 %v1501_v24, %v812_v45 }
 0x3e0   : > { %1502 = vrcp.f32 %v848_v52  ;;  %v860_v10 = vand.u32 2147483648, %v848_v52  ;;  %v858_v12 = vand.u32 2147483647, %v848_v52  ;;  %vm854_vm11 = vweird.f32 %v848_v52 }
 0x3e1   : > { %v817_v44 = vsel %vm816_vm15, %v1501_v24, %v813_v51  ;;  %v838_v16 = vmul.f32 %v837_v11, %v1996_v62 }
 0x3e2   : > { %v822_v58 = vsel %vm819_vm1, %v821_v55, %v817_v44  ;;  %v861_v15 = vor.u32 1.1754944e-38, %v860_v10  ;;  %vm859_vm13 = vcmp.eq.f32.partialorder %v858_v12, 8.507059e+37 }
 0x3e3   : > { %v823_v60 = vmul.f32 %v822_v58, %v798_v57 }
 0x3e5   : > { %v1348_v0 = vclamps-f32 %v823_v60, 1.0 }
 0x3e6   : > { %v1503_v1 = vpop.eup %1502 }
 0x3e7   : > { %v866_v4 = vadd.f32 1.0, %v1348_v0  ;;  %v850_v7 = vmul.f32 %v1503_v1, %v848_v52  ;;  %vm855_vm2 = vweird.f32 %v1503_v1 }
 0x3e8   : > { %vm856_vm12 = vmor %vm854_vm11, %vm855_vm2 }
 0x3e9   : > { %v868_v8 = vmul.f32 %v866_v4, %v775_v2  ;;  %v851_v9 = vsub.f32 1.0, %v850_v7 }
 0x3eb   : > { %872 = vrot.lane.b32.xlu0 %v868_v8, %s1715_s16  ;;  %v852_v42 = vmul.f32 %v1503_v1, %v851_v9 }
 0x3ed   : > { %v853_v14 = vadd.f32 %v1503_v1, %v852_v42 }
 0x3ef   : > { %v857_v18 = vsel %vm856_vm12, %v1503_v1, %v853_v14 }
 0x3f0   : > { %v862_v39 = vsel %vm859_vm13, %v861_v15, %v857_v18 }
 0x3f1   : > { %v863_v3 = vmul.f32 %v862_v39, %v838_v16 }
 0x3f3   : > { %v1349_v19 = vclamps-f32 %v863_v3, 1.0 }
 0x3f5   : > { %v867_v22 = vadd.f32 1.0, %v1349_v19 }
 0x3f7   : > { %v869_v23 = vmul.f32 %v867_v22, %v776_v20  ;;  %v1049_v22 = vld [vmem:[#allocation10] sm:$0xff] }
 0x3f9   : > { %874 = vrot.lane.b32.xlu1 %v869_v23, %s1715_s16  ;;  %s1360_s16 = sshll.u32 %s1787_s28, 4  ;;  %s1209_s28 = scalar_lea.sflag [#allocation6], %s328_s1 }
 0x45d   : > { %v873_v24 = vpop.permute.xlu0 %872 }
 0x45e   : > { %881 = vst.msk [vmem:[#allocation2] sm:$0xff] %vm880_vm14, %v873_v24 }
 0x465   : > { %v1010_v25 = vld [vmem:[#allocation2] sm:$0xff] }
 0x466   : > { %1016 = vrot.lane.b32.xlu2 %v1010_v25, %s1719_s8  ;;  %v2007_v28 = vmul.f32 %v1870_v49, %v1010_v25  ;;  %v1031_v49 = vmul.f32 %v1893_v17, %v1010_v25  ;;  %v992_v31 = vmul.f32 %v1883_v6, %v1010_v25  ;;  %v971_v17 = vmul.f32 %v1925_v41, %v1010_v25 }
 0x468   : > { %888 = vst [vmem:[#allocation3] sm:$0xff] %v2007_v28 }
 0x46b   : > { %v875_v62 = vpop.permute.xlu1 %874 }
 0x46c   : > { %v876_v29 = vsel %vm453_vm9, %v873_v24, %v875_v62  ;;  %883 = vst.msk [vmem:[#allocation2 + $0x10] sm:$0xff] %vm453_vm9, %v875_v62  ;;  %vm1074_vm9 = vcmask 588800  }
 0x46d   : > { %882 = vst [vmem:[#allocation2 + $0x8] sm:$0xff] %v876_v29  ;;  %1018 = vrot.lane.b32.xlu0 %v876_v29, %s1719_s8  ;;  %v2015_v59 = vmul.f32 %v1872_v50, %v876_v29  ;;  %v1032_v32 = vmul.f32 %v876_v29, %v1917_v37  ;;  %v993_v33 = vmul.f32 %v876_v29, %v1897_v21 }
 0x46e   : > { %956 = vrot.lane.b32.xlu2 %v1010_v25, %s1716_s18  ;;  %v932_v37 = vmul.f32 %v1943_v54, %v1010_v25  ;;  %v972_v35 = vmul.f32 %v876_v29, %v1934_v47  ;;  %v933_v41 = vmul.f32 %v876_v29, %v1951_v61  ;;  %v912_v47 = vmul.f32 %v876_v29, %v1923_v40 }
 0x46f   : > { %889 = vst [vmem:[#allocation3 + $0x38] sm:$0xff] %v2015_v59 }
 0x473   : > { %v1012_v30 = vld [vmem:[#allocation2 + $0x10] sm:$0xff] }
 0x474   : > { %1020 = vrot.lane.b32.xlu1 %v1012_v30, %s1719_s8  ;;  %v1033_v50 = vmul.f32 %v1904_v26, %v1012_v30  ;;  %v994_v6 = vmul.f32 %v1887_v13, %v1012_v30  ;;  %v973_v21 = vmul.f32 %v1919_v38, %v1012_v30  ;;  %v911_v26 = vmul.f32 %v1906_v27, %v1010_v25  ;;  %v1068_v38 = vld [vmem:[%s2132_s6] sm:$0xff]  ;;  %s330_s8 = scalar_lea.vmem [#allocation12], %s1337_s13 }
 0x475   : > { %958 = vrot.lane.b32.xlu0 %v876_v29, %s1716_s18  ;;  %v934_v13 = vmul.f32 %v1940_v53, %v1012_v30  ;;  %v913_v27 = vmul.f32 %v1910_v34, %v1012_v30 }
 0x476   : > { %1037 = vrot.lane.b32.xlu2 %v1031_v49, %s1718_s22 }
 0x47c   : > { %960 = vrot.lane.b32.xlu1 %v1012_v30, %s1716_s18 }
 0x47d   : > { %1039 = vrot.lane.b32.xlu0 %v1032_v32, %s1718_s22 }
 0x47e   : > { %998 = vrot.lane.b32.xlu2 %v992_v31, %s1717_s21 }
 0x484   : > { %1041 = vrot.lane.b32.xlu1 %v1033_v50, %s1718_s22  ;;  %s1220_s22 = scalar_lea.hbm %s2133_s7, %s1360_s16 }
 0x485   : > { %1000 = vrot.lane.b32.xlu0 %v993_v33, %s1717_s21 }
 0x486   : > { %977 = vrot.lane.b32.xlu2 %v971_v17, %s1721_s14 }
 0x48c   : > { %1002 = vrot.lane.b32.xlu1 %v994_v6, %s1717_s21 }
 0x48d   : > { %979 = vrot.lane.b32.xlu0 %v972_v35, %s1721_s14 }
 0x48e   : > { %938 = vrot.lane.b32.xlu2 %v932_v37, %s1722_s15 }
 0x494   : > { %981 = vrot.lane.b32.xlu1 %v973_v21, %s1721_s14  ;;  %s1224_s14 = sshll.u32 %s1220_s22, 4  ;;  %s1225_s14 = int_to_ptr.hbm [resolvable:$true] %s1224_s14 }
 0x495   : > { %940 = vrot.lane.b32.xlu0 %v933_v41, %s1722_s15 }
 0x496   : > { %917 = vrot.lane.b32.xlu2 %v911_v26, %s1720_s9 }
 0x49c   : > { %942 = vrot.lane.b32.xlu1 %v934_v13, %s1722_s15  ;;  %s1642_s15 = sshra.s32 %s1225_s14, 4  ;;  %s1643_s15 = int_to_ptr.hbm [resolvable:$true] %s1642_s15 }
 0x49d   : > { %919 = vrot.lane.b32.xlu0 %v912_v47, %s1720_s9  ;;  %p1649_p3 = scmp.lt.s32.totalorder %s1643_s15, %s2133_s7 }
 0x49e   : > { %896 = vrot.lane.b32.xlu2 %v1010_v25, %s1723_s17 }
 0x4a4   : > { %921 = vrot.lane.b32.xlu1 %v913_v27, %s1720_s9  ;;  %s1222_s9 = sshll.u32 %s330_s8, 4  ;;  %s1223_s9 = int_to_ptr.vmem [resolvable:$true] %s1222_s9 }
 0x4a5   : > { %898 = vrot.lane.b32.xlu0 %v876_v29, %s1723_s17 }
 0x4a6   : > { %1071 = vperm.xlu2 %1492, %v1068_v38  }
 0x4ac   : > { %900 = vrot.lane.b32.xlu1 %v1012_v30, %s1723_s17  ;;  %s1644_s17 = scalar_lea.hbm %s1643_s15, 16 }
 0x4ad   : > { %p1645_p0 = scmp.ne.s32.totalorder %s1643_s15, %s1644_s17  ;;  %p1650_p4 = scmp.lt.s32.totalorder %s1648_s23, %s1644_s17 }
 0x4af   : > { %p1646_p1 = pnand %p1645_p0, %p1804_p5  ;;  %p1651_p7 = por %p1650_p4, %p1649_p3 }
 0x4b1   : > { %p1647_p2 = pneg %p1646_p1 }
 0x4b3   : > { %p1652_p8 = pnand %p1651_p7, %p1647_p2 }
 0x4c0   : > { %v1017_v40 = vpop.permute.xlu2 %1016 }
 0x4c8   : > { %v957_v53 = vpop.permute.xlu2 %956 }
 0x4d0   : > { %v1038_v43 = vpop.permute.xlu2 %1037 }
 0x4d8   : > { %v999_v52 = vpop.permute.xlu2 %998 }
 0x4df   : > { %v1019_v54 = vpop.permute.xlu0 %1018 }
 0x4e0   : > { %v1022_v61 = vsel %vm670_vm6, %v1017_v40, %v1019_v54  ;;  %v978_v0 = vpop.permute.xlu2 %977 }
 0x4e6   : > { %v1021_v45 = vpop.permute.xlu1 %1020 }
 0x4e7   : > { %v1023_v34 = vsel %vm670_vm6, %v1019_v54, %v1021_v45  ;;  %v959_v46 = vpop.permute.xlu0 %958 }
 0x4e8   : > { %v962_v48 = vsel %vm583_vm3, %v957_v53, %v959_v46  ;;  %v939_v7 = vpop.permute.xlu2 %938 }
 0x4e9   : > { %966 = vst [vmem:[#allocation3 + $0x88] sm:$0xff] %v962_v48 }
 0x4ee   : > { %v961_v51 = vpop.permute.xlu1 %960 }
 0x4ef   : > { %v963_v55 = vsel %vm583_vm3, %v959_v46, %v961_v51  ;;  %v1040_v56 = vpop.permute.xlu0 %1039 }
 0x4f0   : > { %967 = vst [vmem:[#allocation3 + $0x40] sm:$0xff] %v963_v55  ;;  %v1043_v57 = vsel %vm701_vm4, %v1038_v43, %v1040_v56  ;;  %v918_v42 = vpop.permute.xlu2 %917 }
 0x4f1   : > { %1085 = vmatpush.msra.mxu2 %v1043_v57 }
 0x4f3   : > { %1086 = vmatpush.msra.mxu2 %v1022_v61 }
 0x4f6   : > { %v1042_v44 = vpop.permute.xlu1 %1041 }
 0x4f7   : > { %v1044_v58 = vsel %vm701_vm4, %v1040_v56, %v1042_v44  ;;  %v1001_v60 = vpop.permute.xlu0 %1000 }
 0x4f8   : > { %v1004_v63 = vsel %vm648_vm5, %v999_v52, %v1001_v60  ;;  %1105 = vmatpush.msra.mxu3 %v1044_v58  ;;  %v897_v39 = vpop.permute.xlu2 %896 }
 0x4f9   : > { %1087 = vmatpush.msra.mxu2 %v1004_v63 }
 0x4fa   : > { %1106 = vmatpush.msra.mxu3 %v1023_v34 }
 0x4fe   : > { %v1003_v1 = vpop.permute.xlu1 %1002 }
 0x4ff   : > { %v1005_v2 = vsel %vm648_vm5, %v1001_v60, %v1003_v1  ;;  %v980_v4 = vpop.permute.xlu0 %979 }
 0x500   : > { %v983_v5 = vsel %vm617_vm8, %v978_v0, %v980_v4  ;;  %1107 = vmatpush.msra.mxu3 %v1005_v2  ;;  %v1072_v25 = vpop.permute.xlu2 %1071 }
 0x501   : > { %1088 = vmatpush.msra.mxu2 %v983_v5 }
 0x503   : > { %1089 = vmatpush.msra.mxu2 %v962_v48 }
 0x506   : > { %v982_v8 = vpop.permute.xlu1 %981 }
 0x507   : > { %v984_v9 = vsel %vm617_vm8, %v980_v4, %v982_v8  ;;  %v941_v10 = vpop.permute.xlu0 %940 }
 0x508   : > { %v944_v11 = vsel %vm564_vm10, %v939_v7, %v941_v10  ;;  %1108 = vmatpush.msra.mxu3 %v984_v9 }
 0x509   : > { %948 = vst [vmem:[#allocation3 + $0x70] sm:$0xff] %v944_v11  ;;  %1090 = vmatpush.msra.mxu2 %v944_v11 }
 0x50a   : > { %1109 = vmatpush.msra.mxu3 %v963_v55 }
 0x50e   : > { %v943_v12 = vpop.permute.xlu1 %942 }
 0x50f   : > { %v945_v14 = vsel %vm564_vm10, %v941_v10, %v943_v12  ;;  %v920_v15 = vpop.permute.xlu0 %919 }
 0x510   : > { %949 = vst [vmem:[#allocation3 + $0x80] sm:$0xff] %v945_v14  ;;  %v923_v16 = vsel %vm528_vm7, %v918_v42, %v920_v15  ;;  %1110 = vmatpush.msra.mxu3 %v945_v14 }
 0x511   : > { %927 = vst [vmem:[#allocation3 + $0x20] sm:$0xff] %v923_v16  ;;  %1091 = vmatpush.msra.mxu2 %v923_v16 }
 0x516   : > { %v922_v18 = vpop.permute.xlu1 %921 }
 0x517   : > { %v924_v3 = vsel %vm528_vm7, %v920_v15, %v922_v18  ;;  %v899_v19 = vpop.permute.xlu0 %898 }
 0x518   : > { %928 = vst [vmem:[#allocation3 + $0x8] sm:$0xff] %v924_v3  ;;  %v902_v20 = vsel %vm495_vm0, %v897_v39, %v899_v19  ;;  %1111 = vmatpush.msra.mxu3 %v924_v3 }
 0x519   : > { %906 = vst [vmem:[#allocation3 + $0x78] sm:$0xff] %v902_v20  ;;  %1092 = vmatpush.msra.mxu2 %v902_v20 }
 0x51b   : > { %1093 = vmatpush.msra.mxu2 %v2007_v28 }
 0x51c   : > { %1350 = vmatmul.msk.f32.vlgmr.msra.gmra.mxu2 %vm1074_vm9, %v1049_v22 }
 0x51e   : > { %v901_v23 = vpop.permute.xlu1 %900 }
 0x51f   : > { %v903_v24 = vsel %vm495_vm0, %v899_v19, %v901_v23 }
 0x520   : > { %907 = vst [vmem:[#allocation3 + $0x58] sm:$0xff] %v903_v24  ;;  %1112 = vmatpush.msra.mxu3 %v903_v24 }
 0x522   : > { %1113 = vmatpush.msra.mxu3 %v2015_v59 }
 0x523   : > { %1351 = vmatmul.msk.f32.vlgmr.msra.gmra.mxu3 %vm1074_vm9, %v1049_v22 }
 0x59f   : > { %v1095_v62 = vpop.f32.mrf.mxu2 }
 0x5a0   : > { %v2075_v29 = vadd.f32 %v1095_v62, %v1072_v25 }
 0x5a2   : > { %v1120_v30 = vmul.f32 %v2075_v29, %v1986_v36 }
 0x5a4   : > { %v1122_v49 = vmul.f32 %v1120_v30, %v1120_v30 }
 0x5a6   : > { %v1123_v31 = vmin.f32 %v1122_v49, 16.0  ;;  %v1115_v32 = vpop.f32.mrf.mxu3 }
 0x5a7   : > { %v2079_v28 = vadd.f32 %v1115_v32, %v1072_v25 }
 0x5a8   : > { %v1124_v50 = vmul.f32 2.1237322e-06, %v1123_v31  ;;  %v1135_v17 = vmul.f32 3.8918573e-05, %v1123_v31 }
 0x5a9   : > { %v2083_v33 = vmul.f32 %v2079_v28, %v1986_v36 }
 0x5aa   : > { %v1125_v59 = vadd.f32 0.00028619796, %v1124_v50  ;;  %v1136_v6 = vadd.f32 0.001143296, %v1135_v17 }
 0x5ab   : > { %v1162_v37 = vmul.f32 %v2083_v33, %v2083_v33 }
 0x5ac   : > { %v1126_v35 = vmul.f32 %v1125_v59, %v1123_v31  ;;  %v1137_v21 = vmul.f32 %v1136_v6, %v1123_v31  ;;  %v1118_v59 = vmul.f32 0.5, %v2075_v29 }
 0x5ad   : > { %v1163_v26 = vmin.f32 %v1162_v37, 16.0 }
 0x5ae   : > { %v1138_v41 = vadd.f32 0.014752088, %v1137_v21  ;;  %v1127_v13 = vadd.f32 0.0036580483, %v1126_v35 }
 0x5af   : > { %v1164_v47 = vmul.f32 2.1237322e-06, %v1163_v26  ;;  %v1175_v27 = vmul.f32 3.8918573e-05, %v1163_v26 }
 0x5b0   : > { %v1139_v38 = vmul.f32 %v1138_v41, %v1123_v31  ;;  %v1128_v61 = vmul.f32 %v1127_v13, %v1123_v31  ;;  %v1119_v13 = vmul.f32 0.5, %v2079_v28 }
 0x5b1   : > { %v1165_v40 = vadd.f32 0.00028619796, %v1164_v47  ;;  %v1176_v53 = vadd.f32 0.001143296, %v1175_v27 }
 0x5b2   : > { %v1140_v54 = vadd.f32 0.112945676, %v1139_v38  ;;  %v1129_v51 = vadd.f32 0.05243302, %v1128_v61 }
 0x5b3   : > { %v1166_v43 = vmul.f32 %v1165_v40, %v1163_v26  ;;  %v1177_v36 = vmul.f32 %v1176_v53, %v1163_v26 }
 0x5b4   : > { %v1141_v45 = vmul.f32 %v1140_v54, %v1123_v31  ;;  %v1130_v58 = vmul.f32 %v1129_v51, %v1123_v31 }
 0x5b5   : > { %v1178_v34 = vadd.f32 0.014752088, %v1177_v36  ;;  %v1167_v48 = vadd.f32 0.0036580483, %v1166_v43 }
 0x5b6   : > { %v1142_v46 = vadd.f32 0.4994258, %v1141_v45  ;;  %v1131_v1 = vadd.f32 0.18741608, %v1130_v58 }
 0x5b7   : > { %v1179_v52 = vmul.f32 %v1178_v34, %v1163_v26  ;;  %v1168_v44 = vmul.f32 %v1167_v48, %v1163_v26 }
 0x5b8   : > { %v1143_v55 = vmul.f32 %v1142_v46, %v1123_v31  ;;  %v1132_v8 = vmul.f32 %v1131_v1, %v1123_v31 }
 0x5b9   : > { %v1180_v56 = vadd.f32 0.112945676, %v1179_v52  ;;  %v1169_v0 = vadd.f32 0.05243302, %v1168_v44 }
 0x5ba   : > { %v1144_v57 = vadd.f32 1.0, %v1143_v55  ;;  %v1133_v12 = vadd.f32 1.1283791, %v1132_v8 }
 0x5bb   : > { %v1181_v60 = vmul.f32 %v1180_v56, %v1163_v26  ;;  %v1170_v7 = vmul.f32 %v1169_v0, %v1163_v26 }
 0x5bc   : > { %1504 = vrcp.f32 %v1144_v57  ;;  %v1156_v11 = vand.u32 2147483648, %v1144_v57  ;;  %v1154_v15 = vand.u32 2147483647, %v1144_v57  ;;  %vm1150_vm4 = vweird.f32 %v1144_v57 }
 0x5bd   : > { %v1182_v63 = vadd.f32 0.4994258, %v1181_v60  ;;  %v1171_v42 = vadd.f32 0.18741608, %v1170_v7  ;;  %v1134_v20 = vmul.f32 %v1133_v12, %v1120_v30 }
 0x5be   : > { %v1157_v39 = vor.u32 1.1754944e-38, %v1156_v11  ;;  %vm1155_vm6 = vcmp.eq.f32.partialorder %v1154_v15, 8.507059e+37 }
 0x5bf   : > { %v1183_v2 = vmul.f32 %v1182_v63, %v1163_v26  ;;  %v1172_v3 = vmul.f32 %v1171_v42, %v1163_v26 }
 0x5c1   : > { %v1184_v4 = vadd.f32 1.0, %v1183_v2  ;;  %v1173_v49 = vadd.f32 1.1283791, %v1172_v3 }
 0x5c2   : > { %v1505_v5 = vpop.eup %1504 }
 0x5c3   : > { %v1146_v9 = vmul.f32 %v1505_v5, %v1144_v57  ;;  %1506 = vrcp.f32 %v1184_v4  ;;  %vm1151_vm3 = vweird.f32 %v1505_v5  ;;  %v1196_v62 = vand.u32 2147483648, %v1184_v4 }
 0x5c4   : > { %vm1152_vm5 = vmor %vm1150_vm4, %vm1151_vm3  ;;  %v1194_v32 = vand.u32 2147483647, %v1184_v4  ;;  %vm1190_vm8 = vweird.f32 %v1184_v4  ;;  %v1174_v37 = vmul.f32 %v1173_v49, %v2083_v33 }
 0x5c5   : > { %v1147_v10 = vsub.f32 1.0, %v1146_v9  ;;  %v1197_v6 = vor.u32 1.1754944e-38, %v1196_v62 }
 0x5c6   : > { %vm1195_vm0 = vcmp.eq.f32.partialorder %v1194_v32, 8.507059e+37 }
 0x5c7   : > { %v1148_v14 = vmul.f32 %v1505_v5, %v1147_v10 }
 0x5c9   : > { %v1507_v16 = vpop.eup %1506  ;;  %v1149_v18 = vadd.f32 %v1505_v5, %v1148_v14 }
 0x5ca   : > { %v1186_v19 = vmul.f32 %v1507_v16, %v1184_v4  ;;  %vm1191_vm7 = vweird.f32 %v1507_v16 }
 0x5cb   : > { %v1153_v22 = vsel %vm1152_vm5, %v1505_v5, %v1149_v18  ;;  %vm1192_vm10 = vmor %vm1190_vm8, %vm1191_vm7 }
 0x5cc   : > { %v1158_v23 = vsel %vm1155_vm6, %v1157_v39, %v1153_v22  ;;  %v1187_v24 = vsub.f32 1.0, %v1186_v19 }
 0x5cd   : > { %v1159_v25 = vmul.f32 %v1158_v23, %v1134_v20 }
 0x5ce   : > { %v1188_v31 = vmul.f32 %v1507_v16, %v1187_v24 }
 0x5cf   : > { %v1352_v50 = vclamps-f32 %v1159_v25, 1.0 }
 0x5d0   : > { %v1189_v17 = vadd.f32 %v1507_v16, %v1188_v31 }
 0x5d1   : > { %v1202_v30 = vadd.f32 1.0, %v1352_v50 }
 0x5d2   : > { %v1193_v35 = vsel %vm1192_vm10, %v1507_v16, %v1189_v17 }
 0x5d3   : > { %v1204_v21 = vmul.f32 %v1202_v30, %v1118_v59  ;;  %v1198_v26 = vsel %vm1195_vm0, %v1197_v6, %v1193_v35 }
 0x5d4   : > { %v1199_v41 = vmul.f32 %v1198_v26, %v1174_v37 }
 0x5d5   : > { %1206 = vst [vmem:[%s330_s8] sm:$0xff] %v1204_v21 }
 0x5d6   : > { %v1353_v29 = vclamps-f32 %v1199_v41, 1.0 }
 0x5d8   : > { %v1203_v47 = vadd.f32 1.0, %v1353_v29 }
 0x5da   : > { %v1205_v33 = vmul.f32 %v1203_v47, %v1119_v13 }
 0x5dc   : > { %1207 = vst [vmem:[%s330_s8 + $0x8] sm:$0xff] %v1205_v33 }
 0x5dd   : > { %1655 = shalt.err (!%p1652_p8)
}
 0x5de   : > { %1385 = dma.vmem_to_hbm [thread:$0]  (%p1804_p5), %s1223_s9, 256, %s1225_s14, %s1209_s28  }
 0x5df PF: > { %p1412_p9 = scmp.ge.s32.totalorder %s1702_s27, 2  ;;  %s1236_s1 = sand.u32 1, %s1690_s24  }
 0x5e0   : > { %s1237_s16 = scalar_lea.sflag [#allocation6], %s1236_s1 }
 0x5e1   : > { %p1401_p10 = pnand %p1412_p9, %p1808_p6 }
 0x5e3   : > { %p1402_p11 = pneg %p1401_p10 }
 0x5e5   : > { %1685 = dma.done.wait (%p1402_p11), %s1237_s16, 256  }
 0x5e6   : > { %1687 = vsyncadd (%p1402_p11), %s1237_s16, 4294967040  ;;  %p20_p12 = scmp.ge.s32.totalorder %s1791_s30, 4   ;;  %s2140_s24 = smov %s1694_s25 }
 0x5e7   : > { %s2141_s25 = smov %s1698_s26  ;;  %s2142_s26 = smov %s1802_s10 }
 0x5e8   : > { %s2143_s27 = smov %s1791_s30  ;;  %22 = sbr.rel (!%p20_p12) target bundleno = 8 (0x8), region = 100 }
 0x5ed   :  { %1243 = vsyncpa [#allocation5], 1 }
 0x5ee   :  { %1245 = vsyncpa [#allocation5 + $0x1], 1 }
 0x5ef   :  { %1246 = vsyncpa [#allocation8], 1 }
 0x5f0   :  { %1247 = vsyncpa [#allocation11], 1 }
 0x5f1   :  { %1248 = vsyncpa [#allocation6], 1 }
 0x5f2   :  { %1250 = vsyncpa [#allocation6 + $0x1], 1 }

</bundles_post_ra>
